<compile_context>
chip_gen: v6e
topology: v6e:2x2x1
jax: 0.10.0
libtpu: 0.0.40
codegen_flags: <defaults>
</compile_context>

<pallas_src>
import functools
import numpy as np
import jax
import jax.numpy as jnp
from jax.experimental import pallas as pl
from jax.experimental.pallas import tpu as pltpu


LN_EPS = 1e-5
HEAD_PAD = 128   # lane-dense decoder head width (>= n_out)


# ----------------------------------------------------------------------------
# Fused Pallas kernel: entire forward for one batch element
# ----------------------------------------------------------------------------

def fused_forward_kernel(
    ge_ref, vin_ref, gq_ref,
    ve_w1_ref, ve_b1_ref, ve_w2_ref, ve_b2_ref,
    gam_ref, bet_ref, w_in_ref, b_in_ref, filt_ref, w_out_ref, b_out_ref,
    dw1_ref, db1_ref, dw2_ref, db2_ref, dw3_ref, db3_ref,
    latent_ref, pred_ref):
  """Per-batch-element forward: embed -> L hyena layers -> decoder."""
  f32 = jnp.float32
  bf16 = jnp.bfloat16

  S, D = ge_ref.shape                       # (seq, channels)
  L = w_in_ref.shape[0]                     # number of hyena layers
  K = filt_ref.shape[1]                     # conv taps (<= S)

  # ---- value-embedding MLP: GELU(vin @ W1 + b1) @ W2 + b2 ------------------
  h = jnp.dot(vin_ref[...].astype(bf16), ve_w1_ref[...],
              preferred_element_type=f32) + ve_b1_ref[...]
  h = jax.nn.gelu(h, approximate=True)      # tanh approx (PyTorch uses erf)
  val_emb = jnp.dot(h.astype(bf16), ve_w2_ref[...],
                    preferred_element_type=f32) + ve_b2_ref[...]
  x = ge_ref[...] + val_emb                 # (S, D) f32

  # Hoisted row index for the causal-conv mask (shared by all layers / taps).
  row_idx = jax.lax.broadcasted_iota(jnp.int32, (S, 1), 0)

  # ---- Hyena stack (static unroll over stacked layer weights) --------------
  for l in range(L):
    # Pre-LayerNorm (f32).
    mu = jnp.mean(x, axis=-1, keepdims=True)
    var = jnp.mean(jnp.square(x - mu), axis=-1, keepdims=True)
    xn = (x - mu) * jax.lax.rsqrt(var + LN_EPS)
    xn = xn * gam_ref[l] + bet_ref[l]

    # in_proj D -> 3D, split (x1, x2, v), gate.
    proj = jnp.dot(xn.astype(bf16), w_in_ref[l],
                   preferred_element_type=f32) + b_in_ref[l]      # (S, 3D)
    x1 = proj[:, 0:D]
    x2 = proj[:, D:2 * D]
    v = proj[:, 2 * D:3 * D]
    z = x1 * v                                                     # (S, D)

    # Depthwise causal conv: y[s,c] = sum_j filt[j,c] * z[s-j,c].
    # pltpu.roll (np.roll semantics): rolled[s] = z[s-j]; wrapped rows masked.
    filt = filt_ref[l]                                             # (K, D)
    acc = z * filt[0:1, :]
    for j in range(1, K):                                          # small, static
      rolled = pltpu.roll(z, shift=j, axis=0)
      acc = acc + jnp.where(row_idx >= j, rolled, 0.0) * filt[j:j + 1, :]

    y = x2 * acc
    out = jnp.dot(y.astype(bf16), w_out_ref[l],
                  preferred_element_type=f32) + b_out_ref[l]
    x = x + out                                                    # residual

  latent_ref[...] = x

  # ---- decoder: mean-pool latent, condition queries, 2 GELU layers, head ---
  pooled = jnp.mean(x, axis=0, keepdims=True)                      # (1, D)
  hq = gq_ref[...] + pooled                                        # (T, D)
  hq = jax.nn.gelu(jnp.dot(hq.astype(bf16), dw1_ref[...],
                           preferred_element_type=f32) + db1_ref[...],
                   approximate=True)
  hq = jax.nn.gelu(jnp.dot(hq.astype(bf16), dw2_ref[...],
                           preferred_element_type=f32) + db2_ref[...],
                   approximate=True)
  # Lane-dense head: dw3 is (D, HEAD_PAD), zero beyond n_out -> full-lane store.
  pred_ref[...] = jnp.dot(hq.astype(bf16), dw3_ref[...],
                          preferred_element_type=f32) + db3_ref[...]


# ----------------------------------------------------------------------------
# pallas_call plumbing
# ----------------------------------------------------------------------------

def fused_forward(ge, val_in, gq, p, *, kernel_taps):
  B, S, D = ge.shape
  E = val_in.shape[-1]
  T = gq.shape[1]
  L, _, D3 = p["w_ins"].shape
  NP = p["dec_w3p"].shape[1]
  K = kernel_taps
  # Taps beyond the sequence length only ever see zero padding -> drop them.
  filts = p["filts"][:, :K]

  def full(shape):
    nd = len(shape)
    return pl.BlockSpec(shape, lambda b, _nd=nd: (0,) * _nd)

  in_specs = [
      pl.BlockSpec((None, S, D), lambda b: (b, 0, 0)),   # gene embeddings
      pl.BlockSpec((None, S, E), lambda b: (b, 0, 0)),   # value-MLP inputs
      pl.BlockSpec((None, T, D), lambda b: (b, 0, 0)),   # gene queries
      full((E, D)), full((1, D)), full((D, D)), full((1, D)),     # val-emb MLP
      full((L, 1, D)), full((L, 1, D)),                           # gamma, beta
      full((L, D, D3)), full((L, 1, D3)),                         # w_in, b_in
      full((L, K, D)),                                            # conv filters
      full((L, D, D)), full((L, 1, D)),                           # w_out, b_out
      full((D, D)), full((1, D)), full((D, D)), full((1, D)),     # decoder MLP
      full((D, NP)), full((1, NP)),                               # padded head
  ]
  out_specs = (
      pl.BlockSpec((None, S, D), lambda b: (b, 0, 0)),   # latent
      pl.BlockSpec((None, T, NP), lambda b: (b, 0, 0)),  # padded gene_pred
  )

  operands = (ge, val_in, gq,
              p["ve_w1"], p["ve_b1"], p["ve_w2"], p["ve_b2"],
              p["gammas"], p["betas"], p["w_ins"], p["b_ins"], filts,
              p["w_outs"], p["b_outs"],
              p["dec_w1"], p["dec_b1"], p["dec_w2"], p["dec_b2"],
              p["dec_w3p"], p["dec_b3p"])

  flops = 2 * B * (S * E * D + S * D * D
                   + L * (S * D * D3 + S * D * D + S * K * D)
                   + 2 * T * D * D + T * D * NP)
  transcendentals = B * (S * D + 2 * T * D)
  bytes_accessed = (B * S * D * 4 + B * T * NP * 4
                    + sum(int(np.prod(a.shape)) * np.dtype(a.dtype).itemsize
                          for a in operands))

  latent, pred_pad = pl.pallas_call(
      fused_forward_kernel,
      out_shape=(jax.ShapeDtypeStruct((B, S, D), jnp.float32),
                 jax.ShapeDtypeStruct((B, T, NP), jnp.float32)),
      grid=(B,),
      in_specs=in_specs,
      out_specs=out_specs,
      compiler_params=pltpu.CompilerParams(
          dimension_semantics=("parallel",),
          vmem_limit_bytes=32 * 1024 * 1024),
      cost_estimate=pl.CostEstimate(
          flops=int(flops),
          transcendentals=int(transcendentals),
          bytes_accessed=int(bytes_accessed)),
  )(*operands)
  return latent, pred_pad


# ----------------------------------------------------------------------------
# Parameter init (deterministic, in-script) and forward
# ----------------------------------------------------------------------------

def init_params(key, *, seq_len, seq_dim, emb_dim, n_layers, kernel_size,
                hidden_dim, n_out):
  ks = iter(jax.random.split(key, 16 + 8 * n_layers))
  f32, bf16 = jnp.float32, jnp.bfloat16

  def nrm(k, shape, scale, dtype=f32):
    return (scale * jax.random.normal(k, shape)).astype(dtype)

  pad = seq_len  # padding_idx
  params = {}
  params["gene_emb"] = nrm(next(ks), (seq_len + 1, seq_dim), 0.02
                           ).at[pad].set(0.0)
  params["gene_val_emb_input"] = nrm(next(ks), (seq_len + 1, emb_dim), 0.02
                                     ).at[pad].set(0.0)

  # MLPEmbedding for gene values (matmul weights kept bf16 for the MXU).
  params["ve_w1"] = nrm(next(ks), (emb_dim, seq_dim), 1.0 / np.sqrt(emb_dim), bf16)
  params["ve_b1"] = jnp.zeros((1, seq_dim), f32)
  params["ve_w2"] = nrm(next(ks), (seq_dim, seq_dim), 1.0 / np.sqrt(seq_dim), bf16)
  params["ve_b2"] = jnp.zeros((1, seq_dim), f32)

  # Hyena layers, stacked on a leading layer axis for the fused kernel.
  gammas, betas, w_ins, b_ins, filts, w_outs, b_outs = [], [], [], [], [], [], []
  t = (jnp.arange(kernel_size, dtype=f32) / kernel_size)[:, None]
  for _ in range(n_layers):
    # Implicit filter: positions -> sin MLP (hidden_dim) -> per-channel taps.
    wf1 = nrm(next(ks), (1, hidden_dim), 1.0)
    bf1 = nrm(next(ks), (1, hidden_dim), 1.0)
    wf2 = nrm(next(ks), (hidden_dim, seq_dim), 1.0 / np.sqrt(hidden_dim))
    filt = jnp.sin(t @ wf1 * 8.0 + bf1) @ wf2
    filt = (filt * jnp.exp(-2.0 * t)) / kernel_size              # (K, D)
    gammas.append(jnp.ones((1, seq_dim), f32))
    betas.append(jnp.zeros((1, seq_dim), f32))
    w_ins.append(nrm(next(ks), (seq_dim, 3 * seq_dim),
                     1.0 / np.sqrt(seq_dim), bf16))
    b_ins.append(jnp.zeros((1, 3 * seq_dim), f32))
    filts.append(filt)
    w_outs.append(nrm(next(ks), (seq_dim, seq_dim), 1.0 / np.sqrt(seq_dim), bf16))
    b_outs.append(jnp.zeros((1, seq_dim), f32))
  params["gammas"] = jnp.stack(gammas)
  params["betas"] = jnp.stack(betas)
  params["w_ins"] = jnp.stack(w_ins)
  params["b_ins"] = jnp.stack(b_ins)
  params["filts"] = jnp.stack(filts)
  params["w_outs"] = jnp.stack(w_outs)
  params["b_outs"] = jnp.stack(b_outs)

  # Decoder (2 hidden GELU layers + linear head). Head weight/bias are zero-
  # padded to HEAD_PAD output lanes so the kernel's final store is lane-dense.
  params["dec_w1"] = nrm(next(ks), (seq_dim, seq_dim), 1.0 / np.sqrt(seq_dim), bf16)
  params["dec_b1"] = jnp.zeros((1, seq_dim), f32)
  params["dec_w2"] = nrm(next(ks), (seq_dim, seq_dim), 1.0 / np.sqrt(seq_dim), bf16)
  params["dec_b2"] = jnp.zeros((1, seq_dim), f32)
  w3 = nrm(next(ks), (seq_dim, n_out), 1.0 / np.sqrt(seq_dim))
  params["dec_w3p"] = (jnp.zeros((seq_dim, HEAD_PAD), f32)
                       .at[:, :n_out].set(w3).astype(bf16))
  params["dec_b3p"] = jnp.zeros((1, HEAD_PAD), f32)
  return params


@functools.partial(jax.jit, static_argnames=("n_out",))
def hyena_forward(params, gene_ids, gene_target_ids, gene_vals, *, n_out=1):
  """Returns (gene_pred, latent, feature_pred, zinb_out) like the PyTorch module."""
  B, S = gene_ids.shape

  # _gene_embedding (continuous) — gathers are XLA glue; everything downstream
  # of the gathers runs inside the single fused Pallas kernel.
  ge = jnp.take(params["gene_emb"], gene_ids, axis=0)             # (B,S,D)
  gvi = jnp.take(params["gene_val_emb_input"], gene_ids, axis=0)  # (B,S,E)
  val_in = gene_vals[..., None] * gvi                             # (B,S,E)

  # _target_embedding
  gene_query = jnp.take(params["gene_emb"], gene_target_ids, axis=0)  # (B,T,D)

  kernel_taps = min(params["filts"].shape[1], S)
  latent, pred_pad = fused_forward(ge, val_in, gene_query, params,
                                   kernel_taps=kernel_taps)
  gene_pred = pred_pad[..., :n_out]                               # (B,T,n_out)

  feature_pred = None
  zinb_out = None     # loss == 'MSE' branch
  return gene_pred, latent, feature_pred, zinb_out


# ----------------------------------------------------------------------------
# Main
# ----------------------------------------------------------------------------

if __name__ == "__main__":
  B = 2
  seq_len = 16        # also the gene-id vocab size (Embedding(seq_len+1, D))
  query_len = 8
  seq_dim = 128
  emb_dim = 128       # gene_val_emb_input_dim
  n_layers = 2
  kernel_size = 64
  hidden_dim = 256
  n_out = 1           # loss == 'MSE'

  key = jax.random.PRNGKey(0)
  k1, k2, k3, kp = jax.random.split(key, 4)
  gene_ids = jax.random.randint(k1, (B, seq_len), 0, seq_len, dtype=jnp.int32)
  gene_target_ids = jax.random.randint(k2, (B, query_len), 0, seq_len,
                                       dtype=jnp.int32)
  gene_vals = jax.random.uniform(k3, (B, seq_len), dtype=jnp.float32)

  params = init_params(kp, seq_len=seq_len, seq_dim=seq_dim, emb_dim=emb_dim,
                       n_layers=n_layers, kernel_size=kernel_size,
                       hidden_dim=hidden_dim, n_out=n_out)

  gene_pred, latent, feature_pred, zinb_out = hyena_forward(
      params, gene_ids, gene_target_ids, gene_vals, n_out=n_out)
  jax.block_until_ready((gene_pred, latent))

  assert gene_pred.shape == (B, query_len, n_out)
  assert latent.shape == (B, seq_len, seq_dim)
  assert feature_pred is None and zinb_out is None
  assert bool(jnp.all(jnp.isfinite(gene_pred)))
  assert bool(jnp.all(jnp.isfinite(latent)))
  print("KERNEL_OK")
</pallas_src>

<mosaic_0001>
module attributes {stable_mosaic.version = 11 : i64} {
  func.func @fused_forward_kernel(%arg0: i32, %arg1: memref<1x16x128xf32, #tpu.memory_space<vmem>>, %arg2: memref<1x16x128xf32, #tpu.memory_space<vmem>>, %arg3: memref<1x8x128xf32, #tpu.memory_space<vmem>>, %arg4: memref<128x128xbf16, #tpu.memory_space<vmem>>, %arg5: memref<1x128xf32, #tpu.memory_space<vmem>>, %arg6: memref<128x128xbf16, #tpu.memory_space<vmem>>, %arg7: memref<1x128xf32, #tpu.memory_space<vmem>>, %arg8: memref<2x1x128xf32, #tpu.memory_space<vmem>>, %arg9: memref<2x1x128xf32, #tpu.memory_space<vmem>>, %arg10: memref<2x128x384xbf16, #tpu.memory_space<vmem>>, %arg11: memref<2x1x384xf32, #tpu.memory_space<vmem>>, %arg12: memref<2x16x128xf32, #tpu.memory_space<vmem>>, %arg13: memref<2x128x128xbf16, #tpu.memory_space<vmem>>, %arg14: memref<2x1x128xf32, #tpu.memory_space<vmem>>, %arg15: memref<128x128xbf16, #tpu.memory_space<vmem>>, %arg16: memref<1x128xf32, #tpu.memory_space<vmem>>, %arg17: memref<128x128xbf16, #tpu.memory_space<vmem>>, %arg18: memref<1x128xf32, #tpu.memory_space<vmem>>, %arg19: memref<128x128xbf16, #tpu.memory_space<vmem>>, %arg20: memref<1x128xf32, #tpu.memory_space<vmem>>, %arg21: memref<1x16x128xf32, #tpu.memory_space<vmem>>, %arg22: memref<1x8x128xf32, #tpu.memory_space<vmem>>) attributes {dimension_semantics = [#tpu.dimension_semantics<parallel>], iteration_bounds = array<i64: 2>, scalar_prefetch = 0 : i64, scratch_operands = 0 : i64, tpu.core_type = #tpu.core_type<tc>, window_params = [{transform_indices = @transform_0, window_bounds = array<i64: 1, 16, 128>}, {transform_indices = @transform_1, window_bounds = array<i64: 1, 16, 128>}, {transform_indices = @transform_2, window_bounds = array<i64: 1, 8, 128>}, {pipeline_mode = #tpu.pipeline_mode<synchronous>, transform_indices = @transform_3, window_bounds = array<i64: 128, 128>}, {pipeline_mode = #tpu.pipeline_mode<synchronous>, transform_indices = @transform_4, window_bounds = array<i64: 1, 128>}, {pipeline_mode = #tpu.pipeline_mode<synchronous>, transform_indices = @transform_5, window_bounds = array<i64: 128, 128>}, {pipeline_mode = #tpu.pipeline_mode<synchronous>, transform_indices = @transform_6, window_bounds = array<i64: 1, 128>}, {pipeline_mode = #tpu.pipeline_mode<synchronous>, transform_indices = @transform_7, window_bounds = array<i64: 2, 1, 128>}, {pipeline_mode = #tpu.pipeline_mode<synchronous>, transform_indices = @transform_8, window_bounds = array<i64: 2, 1, 128>}, {pipeline_mode = #tpu.pipeline_mode<synchronous>, transform_indices = @transform_9, window_bounds = array<i64: 2, 128, 384>}, {pipeline_mode = #tpu.pipeline_mode<synchronous>, transform_indices = @transform_10, window_bounds = array<i64: 2, 1, 384>}, {pipeline_mode = #tpu.pipeline_mode<synchronous>, transform_indices = @transform_11, window_bounds = array<i64: 2, 16, 128>}, {pipeline_mode = #tpu.pipeline_mode<synchronous>, transform_indices = @transform_12, window_bounds = array<i64: 2, 128, 128>}, {pipeline_mode = #tpu.pipeline_mode<synchronous>, transform_indices = @transform_13, window_bounds = array<i64: 2, 1, 128>}, {pipeline_mode = #tpu.pipeline_mode<synchronous>, transform_indices = @transform_14, window_bounds = array<i64: 128, 128>}, {pipeline_mode = #tpu.pipeline_mode<synchronous>, transform_indices = @transform_15, window_bounds = array<i64: 1, 128>}, {pipeline_mode = #tpu.pipeline_mode<synchronous>, transform_indices = @transform_16, window_bounds = array<i64: 128, 128>}, {pipeline_mode = #tpu.pipeline_mode<synchronous>, transform_indices = @transform_17, window_bounds = array<i64: 1, 128>}, {pipeline_mode = #tpu.pipeline_mode<synchronous>, transform_indices = @transform_18, window_bounds = array<i64: 128, 128>}, {pipeline_mode = #tpu.pipeline_mode<synchronous>, transform_indices = @transform_19, window_bounds = array<i64: 1, 128>}, {transform_indices = @transform_20, window_bounds = array<i64: 1, 16, 128>}, {transform_indices = @transform_21, window_bounds = array<i64: 1, 8, 128>}]} {
    %c0 = arith.constant 0 : index
    %c0_0 = arith.constant 0 : index
    %c0_1 = arith.constant 0 : index
    %0 = vector.load %arg2[%c0, %c0_0, %c0_1] : memref<1x16x128xf32, #tpu.memory_space<vmem>>, vector<1x16x128xf32>
    %1 = vector.shape_cast %0 : vector<1x16x128xf32> to vector<16x128xf32>
    %2 = arith.truncf %1 : vector<16x128xf32> to vector<16x128xbf16>
    %c0_2 = arith.constant 0 : index
    %c0_3 = arith.constant 0 : index
    %3 = vector.load %arg4[%c0_2, %c0_3] : memref<128x128xbf16, #tpu.memory_space<vmem>>, vector<128x128xbf16>
    %cst = arith.constant dense<0.000000e+00> : vector<16x128xf32>
    %4 = tpu.matmul %2, %3, %cst {dimension_numbers = #tpu.dot_dimension_numbers<[1], [0], [0], [1], [0, 0, 1, 1], [], []>} : vector<16x128xbf16>, vector<128x128xbf16>, vector<16x128xf32> -> vector<16x128xf32>
    %c0_4 = arith.constant 0 : index
    %c0_5 = arith.constant 0 : index
    %5 = vector.load %arg5[%c0_4, %c0_5] : memref<1x128xf32, #tpu.memory_space<vmem>>, vector<1x128xf32>
    %6 = vector.broadcast %5 : vector<1x128xf32> to vector<16x128xf32>
    %7 = arith.addf %4, %6 : vector<16x128xf32>
    %8 = arith.mulf %7, %7 : vector<16x128xf32>
    %9 = arith.mulf %7, %8 : vector<16x128xf32>
    %cst_6 = arith.constant 4.471500e-02 : f32
    %10 = vector.broadcast %cst_6 : f32 to vector<16x128xf32>
    %11 = arith.mulf %10, %9 : vector<16x128xf32>
    %12 = arith.addf %7, %11 : vector<16x128xf32>
    %cst_7 = arith.constant 0.797884583 : f32
    %13 = vector.broadcast %cst_7 : f32 to vector<16x128xf32>
    %14 = arith.mulf %13, %12 : vector<16x128xf32>
    %15 = math.tanh %14 : vector<16x128xf32>
    %cst_8 = arith.constant 1.000000e+00 : f32
    %16 = vector.broadcast %cst_8 : f32 to vector<16x128xf32>
    %17 = arith.addf %16, %15 : vector<16x128xf32>
    %cst_9 = arith.constant 5.000000e-01 : f32
    %18 = vector.broadcast %cst_9 : f32 to vector<16x128xf32>
    %19 = arith.mulf %18, %17 : vector<16x128xf32>
    %20 = arith.mulf %7, %19 : vector<16x128xf32>
    %21 = arith.truncf %20 : vector<16x128xf32> to vector<16x128xbf16>
    %c0_10 = arith.constant 0 : index
    %c0_11 = arith.constant 0 : index
    %22 = vector.load %arg6[%c0_10, %c0_11] : memref<128x128xbf16, #tpu.memory_space<vmem>>, vector<128x128xbf16>
    %cst_12 = arith.constant dense<0.000000e+00> : vector<16x128xf32>
    %23 = tpu.matmul %21, %22, %cst_12 {dimension_numbers = #tpu.dot_dimension_numbers<[1], [0], [0], [1], [0, 0, 1, 1], [], []>} : vector<16x128xbf16>, vector<128x128xbf16>, vector<16x128xf32> -> vector<16x128xf32>
    %c0_13 = arith.constant 0 : index
    %c0_14 = arith.constant 0 : index
    %24 = vector.load %arg7[%c0_13, %c0_14] : memref<1x128xf32, #tpu.memory_space<vmem>>, vector<1x128xf32>
    %25 = vector.broadcast %24 : vector<1x128xf32> to vector<16x128xf32>
    %26 = arith.addf %23, %25 : vector<16x128xf32>
    %c0_15 = arith.constant 0 : index
    %c0_16 = arith.constant 0 : index
    %c0_17 = arith.constant 0 : index
    %27 = vector.load %arg1[%c0_15, %c0_16, %c0_17] : memref<1x16x128xf32, #tpu.memory_space<vmem>>, vector<1x16x128xf32>
    %28 = vector.shape_cast %27 : vector<1x16x128xf32> to vector<16x128xf32>
    %29 = arith.addf %28, %26 : vector<16x128xf32>
    %30 = tpu.iota {dimensions = array<i32: 0>} : vector<16x1xi32>
    %cst_18 = arith.constant dense<0.000000e+00> : vector<16xf32>
    %31 = vector.multi_reduction <add>, %29, %cst_18 [1] : vector<16x128xf32> to vector<16xf32>
    %32 = vector.shape_cast %31 : vector<16xf32> to vector<16x1xf32>
    %cst_19 = arith.constant 1.280000e+02 : f32
    %33 = vector.broadcast %cst_19 : f32 to vector<16x1xf32>
    %34 = arith.divf %32, %33 : vector<16x1xf32>
    %35 = vector.broadcast %34 : vector<16x1xf32> to vector<16x128xf32>
    %36 = arith.subf %29, %35 : vector<16x128xf32>
    %37 = arith.mulf %36, %36 : vector<16x128xf32>
    %cst_20 = arith.constant dense<0.000000e+00> : vector<16xf32>
    %38 = vector.multi_reduction <add>, %37, %cst_20 [1] : vector<16x128xf32> to vector<16xf32>
    %39 = vector.shape_cast %38 : vector<16xf32> to vector<16x1xf32>
    %cst_21 = arith.constant 1.280000e+02 : f32
    %40 = vector.broadcast %cst_21 : f32 to vector<16x1xf32>
    %41 = arith.divf %39, %40 : vector<16x1xf32>
    %42 = vector.broadcast %34 : vector<16x1xf32> to vector<16x128xf32>
    %43 = arith.subf %29, %42 : vector<16x128xf32>
    %cst_22 = arith.constant 9.99999974E-6 : f32
    %44 = vector.broadcast %cst_22 : f32 to vector<16x1xf32>
    %45 = arith.addf %41, %44 : vector<16x1xf32>
    %46 = math.rsqrt %45 : vector<16x1xf32>
    %47 = vector.broadcast %46 : vector<16x1xf32> to vector<16x128xf32>
    %48 = arith.mulf %43, %47 : vector<16x128xf32>
    %c0_23 = arith.constant 0 : index
    %c0_24 = arith.constant 0 : index
    %c0_25 = arith.constant 0 : index
    %49 = vector.load %arg8[%c0_23, %c0_24, %c0_25] : memref<2x1x128xf32, #tpu.memory_space<vmem>>, vector<1x1x128xf32>
    %50 = vector.shape_cast %49 : vector<1x1x128xf32> to vector<1x128xf32>
    %51 = vector.broadcast %50 : vector<1x128xf32> to vector<16x128xf32>
    %52 = arith.mulf %48, %51 : vector<16x128xf32>
    %c0_26 = arith.constant 0 : index
    %c0_27 = arith.constant 0 : index
    %c0_28 = arith.constant 0 : index
    %53 = vector.load %arg9[%c0_26, %c0_27, %c0_28] : memref<2x1x128xf32, #tpu.memory_space<vmem>>, vector<1x1x128xf32>
    %54 = vector.shape_cast %53 : vector<1x1x128xf32> to vector<1x128xf32>
    %55 = vector.broadcast %54 : vector<1x128xf32> to vector<16x128xf32>
    %56 = arith.addf %52, %55 : vector<16x128xf32>
    %57 = arith.truncf %56 : vector<16x128xf32> to vector<16x128xbf16>
    %c0_29 = arith.constant 0 : index
    %c0_30 = arith.constant 0 : index
    %c0_31 = arith.constant 0 : index
    %58 = vector.load %arg10[%c0_29, %c0_30, %c0_31] : memref<2x128x384xbf16, #tpu.memory_space<vmem>>, vector<1x128x384xbf16>
    %59 = vector.shape_cast %58 : vector<1x128x384xbf16> to vector<128x384xbf16>
    %cst_32 = arith.constant dense<0.000000e+00> : vector<16x384xf32>
    %60 = tpu.matmul %57, %59, %cst_32 {dimension_numbers = #tpu.dot_dimension_numbers<[1], [0], [0], [1], [0, 0, 1, 1], [], []>} : vector<16x128xbf16>, vector<128x384xbf16>, vector<16x384xf32> -> vector<16x384xf32>
    %c0_33 = arith.constant 0 : index
    %c0_34 = arith.constant 0 : index
    %c0_35 = arith.constant 0 : index
    %61 = vector.load %arg11[%c0_33, %c0_34, %c0_35] : memref<2x1x384xf32, #tpu.memory_space<vmem>>, vector<1x1x384xf32>
    %62 = vector.shape_cast %61 : vector<1x1x384xf32> to vector<1x384xf32>
    %63 = vector.broadcast %62 : vector<1x384xf32> to vector<16x384xf32>
    %64 = arith.addf %60, %63 : vector<16x384xf32>
    %65 = vector.extract_strided_slice %64 {offsets = [0, 0], sizes = [16, 128], strides = [1, 1]} : vector<16x384xf32> to vector<16x128xf32>
    %66 = vector.extract_strided_slice %64 {offsets = [0, 128], sizes = [16, 128], strides = [1, 1]} : vector<16x384xf32> to vector<16x128xf32>
    %67 = vector.extract_strided_slice %64 {offsets = [0, 256], sizes = [16, 128], strides = [1, 1]} : vector<16x384xf32> to vector<16x128xf32>
    %68 = arith.mulf %65, %67 : vector<16x128xf32>
    %c0_36 = arith.constant 0 : index
    %c0_37 = arith.constant 0 : index
    %c0_38 = arith.constant 0 : index
    %69 = vector.load %arg12[%c0_36, %c0_37, %c0_38] : memref<2x16x128xf32, #tpu.memory_space<vmem>>, vector<1x16x128xf32>
    %70 = vector.shape_cast %69 : vector<1x16x128xf32> to vector<16x128xf32>
    %71 = vector.extract_strided_slice %70 {offsets = [0, 0], sizes = [1, 128], strides = [1, 1]} : vector<16x128xf32> to vector<1x128xf32>
    %72 = vector.broadcast %71 : vector<1x128xf32> to vector<16x128xf32>
    %73 = arith.mulf %68, %72 : vector<16x128xf32>
    %c1_i32 = arith.constant 1 : i32
    %74 = tpu.dynamic_rotate %68 by %c1_i32 dim 0 : vector<16x128xf32>, i32 -> vector<16x128xf32>
    %c1_i32_39 = arith.constant 1 : i32
    %75 = vector.broadcast %c1_i32_39 : i32 to vector<16x1xi32>
    %76 = arith.cmpi sge, %30, %75 : vector<16x1xi32>
    %cst_40 = arith.constant 0.000000e+00 : f32
    %77 = vector.shape_cast %76 : vector<16x1xi1> to vector<16x1xi1>
    %78 = vector.broadcast %77 : vector<16x1xi1> to vector<16x128xi1>
    %79 = vector.broadcast %cst_40 : f32 to vector<16x128xf32>
    %80 = arith.select %78, %74, %79 : vector<16x128xi1>, vector<16x128xf32>
    %81 = vector.extract_strided_slice %70 {offsets = [1, 0], sizes = [1, 128], strides = [1, 1]} : vector<16x128xf32> to vector<1x128xf32>
    %82 = vector.broadcast %81 : vector<1x128xf32> to vector<16x128xf32>
    %83 = arith.mulf %80, %82 : vector<16x128xf32>
    %84 = arith.addf %73, %83 : vector<16x128xf32>
    %c2_i32 = arith.constant 2 : i32
    %85 = tpu.dynamic_rotate %68 by %c2_i32 dim 0 : vector<16x128xf32>, i32 -> vector<16x128xf32>
    %c2_i32_41 = arith.constant 2 : i32
    %86 = vector.broadcast %c2_i32_41 : i32 to vector<16x1xi32>
    %87 = arith.cmpi sge, %30, %86 : vector<16x1xi32>
    %cst_42 = arith.constant 0.000000e+00 : f32
    %88 = vector.shape_cast %87 : vector<16x1xi1> to vector<16x1xi1>
    %89 = vector.broadcast %88 : vector<16x1xi1> to vector<16x128xi1>
    %90 = vector.broadcast %cst_42 : f32 to vector<16x128xf32>
    %91 = arith.select %89, %85, %90 : vector<16x128xi1>, vector<16x128xf32>
    %92 = vector.extract_strided_slice %70 {offsets = [2, 0], sizes = [1, 128], strides = [1, 1]} : vector<16x128xf32> to vector<1x128xf32>
    %93 = vector.broadcast %92 : vector<1x128xf32> to vector<16x128xf32>
    %94 = arith.mulf %91, %93 : vector<16x128xf32>
    %95 = arith.addf %84, %94 : vector<16x128xf32>
    %c3_i32 = arith.constant 3 : i32
    %96 = tpu.dynamic_rotate %68 by %c3_i32 dim 0 : vector<16x128xf32>, i32 -> vector<16x128xf32>
    %c3_i32_43 = arith.constant 3 : i32
    %97 = vector.broadcast %c3_i32_43 : i32 to vector<16x1xi32>
    %98 = arith.cmpi sge, %30, %97 : vector<16x1xi32>
    %cst_44 = arith.constant 0.000000e+00 : f32
    %99 = vector.shape_cast %98 : vector<16x1xi1> to vector<16x1xi1>
    %100 = vector.broadcast %99 : vector<16x1xi1> to vector<16x128xi1>
    %101 = vector.broadcast %cst_44 : f32 to vector<16x128xf32>
    %102 = arith.select %100, %96, %101 : vector<16x128xi1>, vector<16x128xf32>
    %103 = vector.extract_strided_slice %70 {offsets = [3, 0], sizes = [1, 128], strides = [1, 1]} : vector<16x128xf32> to vector<1x128xf32>
    %104 = vector.broadcast %103 : vector<1x128xf32> to vector<16x128xf32>
    %105 = arith.mulf %102, %104 : vector<16x128xf32>
    %106 = arith.addf %95, %105 : vector<16x128xf32>
    %c4_i32 = arith.constant 4 : i32
    %107 = tpu.dynamic_rotate %68 by %c4_i32 dim 0 : vector<16x128xf32>, i32 -> vector<16x128xf32>
    %c4_i32_45 = arith.constant 4 : i32
    %108 = vector.broadcast %c4_i32_45 : i32 to vector<16x1xi32>
    %109 = arith.cmpi sge, %30, %108 : vector<16x1xi32>
    %cst_46 = arith.constant 0.000000e+00 : f32
    %110 = vector.shape_cast %109 : vector<16x1xi1> to vector<16x1xi1>
    %111 = vector.broadcast %110 : vector<16x1xi1> to vector<16x128xi1>
    %112 = vector.broadcast %cst_46 : f32 to vector<16x128xf32>
    %113 = arith.select %111, %107, %112 : vector<16x128xi1>, vector<16x128xf32>
    %114 = vector.extract_strided_slice %70 {offsets = [4, 0], sizes = [1, 128], strides = [1, 1]} : vector<16x128xf32> to vector<1x128xf32>
    %115 = vector.broadcast %114 : vector<1x128xf32> to vector<16x128xf32>
    %116 = arith.mulf %113, %115 : vector<16x128xf32>
    %117 = arith.addf %106, %116 : vector<16x128xf32>
    %c5_i32 = arith.constant 5 : i32
    %118 = tpu.dynamic_rotate %68 by %c5_i32 dim 0 : vector<16x128xf32>, i32 -> vector<16x128xf32>
    %c5_i32_47 = arith.constant 5 : i32
    %119 = vector.broadcast %c5_i32_47 : i32 to vector<16x1xi32>
    %120 = arith.cmpi sge, %30, %119 : vector<16x1xi32>
    %cst_48 = arith.constant 0.000000e+00 : f32
    %121 = vector.shape_cast %120 : vector<16x1xi1> to vector<16x1xi1>
    %122 = vector.broadcast %121 : vector<16x1xi1> to vector<16x128xi1>
    %123 = vector.broadcast %cst_48 : f32 to vector<16x128xf32>
    %124 = arith.select %122, %118, %123 : vector<16x128xi1>, vector<16x128xf32>
    %125 = vector.extract_strided_slice %70 {offsets = [5, 0], sizes = [1, 128], strides = [1, 1]} : vector<16x128xf32> to vector<1x128xf32>
    %126 = vector.broadcast %125 : vector<1x128xf32> to vector<16x128xf32>
    %127 = arith.mulf %124, %126 : vector<16x128xf32>
    %128 = arith.addf %117, %127 : vector<16x128xf32>
    %c6_i32 = arith.constant 6 : i32
    %129 = tpu.dynamic_rotate %68 by %c6_i32 dim 0 : vector<16x128xf32>, i32 -> vector<16x128xf32>
    %c6_i32_49 = arith.constant 6 : i32
    %130 = vector.broadcast %c6_i32_49 : i32 to vector<16x1xi32>
    %131 = arith.cmpi sge, %30, %130 : vector<16x1xi32>
    %cst_50 = arith.constant 0.000000e+00 : f32
    %132 = vector.shape_cast %131 : vector<16x1xi1> to vector<16x1xi1>
    %133 = vector.broadcast %132 : vector<16x1xi1> to vector<16x128xi1>
    %134 = vector.broadcast %cst_50 : f32 to vector<16x128xf32>
    %135 = arith.select %133, %129, %134 : vector<16x128xi1>, vector<16x128xf32>
    %136 = vector.extract_strided_slice %70 {offsets = [6, 0], sizes = [1, 128], strides = [1, 1]} : vector<16x128xf32> to vector<1x128xf32>
    %137 = vector.broadcast %136 : vector<1x128xf32> to vector<16x128xf32>
    %138 = arith.mulf %135, %137 : vector<16x128xf32>
    %139 = arith.addf %128, %138 : vector<16x128xf32>
    %c7_i32 = arith.constant 7 : i32
    %140 = tpu.dynamic_rotate %68 by %c7_i32 dim 0 : vector<16x128xf32>, i32 -> vector<16x128xf32>
    %c7_i32_51 = arith.constant 7 : i32
    %141 = vector.broadcast %c7_i32_51 : i32 to vector<16x1xi32>
    %142 = arith.cmpi sge, %30, %141 : vector<16x1xi32>
    %cst_52 = arith.constant 0.000000e+00 : f32
    %143 = vector.shape_cast %142 : vector<16x1xi1> to vector<16x1xi1>
    %144 = vector.broadcast %143 : vector<16x1xi1> to vector<16x128xi1>
    %145 = vector.broadcast %cst_52 : f32 to vector<16x128xf32>
    %146 = arith.select %144, %140, %145 : vector<16x128xi1>, vector<16x128xf32>
    %147 = vector.extract_strided_slice %70 {offsets = [7, 0], sizes = [1, 128], strides = [1, 1]} : vector<16x128xf32> to vector<1x128xf32>
    %148 = vector.broadcast %147 : vector<1x128xf32> to vector<16x128xf32>
    %149 = arith.mulf %146, %148 : vector<16x128xf32>
    %150 = arith.addf %139, %149 : vector<16x128xf32>
    %c8_i32 = arith.constant 8 : i32
    %151 = tpu.dynamic_rotate %68 by %c8_i32 dim 0 : vector<16x128xf32>, i32 -> vector<16x128xf32>
    %c8_i32_53 = arith.constant 8 : i32
    %152 = vector.broadcast %c8_i32_53 : i32 to vector<16x1xi32>
    %153 = arith.cmpi sge, %30, %152 : vector<16x1xi32>
    %cst_54 = arith.constant 0.000000e+00 : f32
    %154 = vector.shape_cast %153 : vector<16x1xi1> to vector<16x1xi1>
    %155 = vector.broadcast %154 : vector<16x1xi1> to vector<16x128xi1>
    %156 = vector.broadcast %cst_54 : f32 to vector<16x128xf32>
    %157 = arith.select %155, %151, %156 : vector<16x128xi1>, vector<16x128xf32>
    %158 = vector.extract_strided_slice %70 {offsets = [8, 0], sizes = [1, 128], strides = [1, 1]} : vector<16x128xf32> to vector<1x128xf32>
    %159 = vector.broadcast %158 : vector<1x128xf32> to vector<16x128xf32>
    %160 = arith.mulf %157, %159 : vector<16x128xf32>
    %161 = arith.addf %150, %160 : vector<16x128xf32>
    %c9_i32 = arith.constant 9 : i32
    %162 = tpu.dynamic_rotate %68 by %c9_i32 dim 0 : vector<16x128xf32>, i32 -> vector<16x128xf32>
    %c9_i32_55 = arith.constant 9 : i32
    %163 = vector.broadcast %c9_i32_55 : i32 to vector<16x1xi32>
    %164 = arith.cmpi sge, %30, %163 : vector<16x1xi32>
    %cst_56 = arith.constant 0.000000e+00 : f32
    %165 = vector.shape_cast %164 : vector<16x1xi1> to vector<16x1xi1>
    %166 = vector.broadcast %165 : vector<16x1xi1> to vector<16x128xi1>
    %167 = vector.broadcast %cst_56 : f32 to vector<16x128xf32>
    %168 = arith.select %166, %162, %167 : vector<16x128xi1>, vector<16x128xf32>
    %169 = vector.extract_strided_slice %70 {offsets = [9, 0], sizes = [1, 128], strides = [1, 1]} : vector<16x128xf32> to vector<1x128xf32>
    %170 = vector.broadcast %169 : vector<1x128xf32> to vector<16x128xf32>
    %171 = arith.mulf %168, %170 : vector<16x128xf32>
    %172 = arith.addf %161, %171 : vector<16x128xf32>
    %c10_i32 = arith.constant 10 : i32
    %173 = tpu.dynamic_rotate %68 by %c10_i32 dim 0 : vector<16x128xf32>, i32 -> vector<16x128xf32>
    %c10_i32_57 = arith.constant 10 : i32
    %174 = vector.broadcast %c10_i32_57 : i32 to vector<16x1xi32>
    %175 = arith.cmpi sge, %30, %174 : vector<16x1xi32>
    %cst_58 = arith.constant 0.000000e+00 : f32
    %176 = vector.shape_cast %175 : vector<16x1xi1> to vector<16x1xi1>
    %177 = vector.broadcast %176 : vector<16x1xi1> to vector<16x128xi1>
    %178 = vector.broadcast %cst_58 : f32 to vector<16x128xf32>
    %179 = arith.select %177, %173, %178 : vector<16x128xi1>, vector<16x128xf32>
    %180 = vector.extract_strided_slice %70 {offsets = [10, 0], sizes = [1, 128], strides = [1, 1]} : vector<16x128xf32> to vector<1x128xf32>
    %181 = vector.broadcast %180 : vector<1x128xf32> to vector<16x128xf32>
    %182 = arith.mulf %179, %181 : vector<16x128xf32>
    %183 = arith.addf %172, %182 : vector<16x128xf32>
    %c11_i32 = arith.constant 11 : i32
    %184 = tpu.dynamic_rotate %68 by %c11_i32 dim 0 : vector<16x128xf32>, i32 -> vector<16x128xf32>
    %c11_i32_59 = arith.constant 11 : i32
    %185 = vector.broadcast %c11_i32_59 : i32 to vector<16x1xi32>
    %186 = arith.cmpi sge, %30, %185 : vector<16x1xi32>
    %cst_60 = arith.constant 0.000000e+00 : f32
    %187 = vector.shape_cast %186 : vector<16x1xi1> to vector<16x1xi1>
    %188 = vector.broadcast %187 : vector<16x1xi1> to vector<16x128xi1>
    %189 = vector.broadcast %cst_60 : f32 to vector<16x128xf32>
    %190 = arith.select %188, %184, %189 : vector<16x128xi1>, vector<16x128xf32>
    %191 = vector.extract_strided_slice %70 {offsets = [11, 0], sizes = [1, 128], strides = [1, 1]} : vector<16x128xf32> to vector<1x128xf32>
    %192 = vector.broadcast %191 : vector<1x128xf32> to vector<16x128xf32>
    %193 = arith.mulf %190, %192 : vector<16x128xf32>
    %194 = arith.addf %183, %193 : vector<16x128xf32>
    %c12_i32 = arith.constant 12 : i32
    %195 = tpu.dynamic_rotate %68 by %c12_i32 dim 0 : vector<16x128xf32>, i32 -> vector<16x128xf32>
    %c12_i32_61 = arith.constant 12 : i32
    %196 = vector.broadcast %c12_i32_61 : i32 to vector<16x1xi32>
    %197 = arith.cmpi sge, %30, %196 : vector<16x1xi32>
    %cst_62 = arith.constant 0.000000e+00 : f32
    %198 = vector.shape_cast %197 : vector<16x1xi1> to vector<16x1xi1>
    %199 = vector.broadcast %198 : vector<16x1xi1> to vector<16x128xi1>
    %200 = vector.broadcast %cst_62 : f32 to vector<16x128xf32>
    %201 = arith.select %199, %195, %200 : vector<16x128xi1>, vector<16x128xf32>
    %202 = vector.extract_strided_slice %70 {offsets = [12, 0], sizes = [1, 128], strides = [1, 1]} : vector<16x128xf32> to vector<1x128xf32>
    %203 = vector.broadcast %202 : vector<1x128xf32> to vector<16x128xf32>
    %204 = arith.mulf %201, %203 : vector<16x128xf32>
    %205 = arith.addf %194, %204 : vector<16x128xf32>
    %c13_i32 = arith.constant 13 : i32
    %206 = tpu.dynamic_rotate %68 by %c13_i32 dim 0 : vector<16x128xf32>, i32 -> vector<16x128xf32>
    %c13_i32_63 = arith.constant 13 : i32
    %207 = vector.broadcast %c13_i32_63 : i32 to vector<16x1xi32>
    %208 = arith.cmpi sge, %30, %207 : vector<16x1xi32>
    %cst_64 = arith.constant 0.000000e+00 : f32
    %209 = vector.shape_cast %208 : vector<16x1xi1> to vector<16x1xi1>
    %210 = vector.broadcast %209 : vector<16x1xi1> to vector<16x128xi1>
    %211 = vector.broadcast %cst_64 : f32 to vector<16x128xf32>
    %212 = arith.select %210, %206, %211 : vector<16x128xi1>, vector<16x128xf32>
    %213 = vector.extract_strided_slice %70 {offsets = [13, 0], sizes = [1, 128], strides = [1, 1]} : vector<16x128xf32> to vector<1x128xf32>
    %214 = vector.broadcast %213 : vector<1x128xf32> to vector<16x128xf32>
    %215 = arith.mulf %212, %214 : vector<16x128xf32>
    %216 = arith.addf %205, %215 : vector<16x128xf32>
    %c14_i32 = arith.constant 14 : i32
    %217 = tpu.dynamic_rotate %68 by %c14_i32 dim 0 : vector<16x128xf32>, i32 -> vector<16x128xf32>
    %c14_i32_65 = arith.constant 14 : i32
    %218 = vector.broadcast %c14_i32_65 : i32 to vector<16x1xi32>
    %219 = arith.cmpi sge, %30, %218 : vector<16x1xi32>
    %cst_66 = arith.constant 0.000000e+00 : f32
    %220 = vector.shape_cast %219 : vector<16x1xi1> to vector<16x1xi1>
    %221 = vector.broadcast %220 : vector<16x1xi1> to vector<16x128xi1>
    %222 = vector.broadcast %cst_66 : f32 to vector<16x128xf32>
    %223 = arith.select %221, %217, %222 : vector<16x128xi1>, vector<16x128xf32>
    %224 = vector.extract_strided_slice %70 {offsets = [14, 0], sizes = [1, 128], strides = [1, 1]} : vector<16x128xf32> to vector<1x128xf32>
    %225 = vector.broadcast %224 : vector<1x128xf32> to vector<16x128xf32>
    %226 = arith.mulf %223, %225 : vector<16x128xf32>
    %227 = arith.addf %216, %226 : vector<16x128xf32>
    %c15_i32 = arith.constant 15 : i32
    %228 = tpu.dynamic_rotate %68 by %c15_i32 dim 0 : vector<16x128xf32>, i32 -> vector<16x128xf32>
    %c15_i32_67 = arith.constant 15 : i32
    %229 = vector.broadcast %c15_i32_67 : i32 to vector<16x1xi32>
    %230 = arith.cmpi sge, %30, %229 : vector<16x1xi32>
    %cst_68 = arith.constant 0.000000e+00 : f32
    %231 = vector.shape_cast %230 : vector<16x1xi1> to vector<16x1xi1>
    %232 = vector.broadcast %231 : vector<16x1xi1> to vector<16x128xi1>
    %233 = vector.broadcast %cst_68 : f32 to vector<16x128xf32>
    %234 = arith.select %232, %228, %233 : vector<16x128xi1>, vector<16x128xf32>
    %235 = vector.extract_strided_slice %70 {offsets = [15, 0], sizes = [1, 128], strides = [1, 1]} : vector<16x128xf32> to vector<1x128xf32>
    %236 = vector.broadcast %235 : vector<1x128xf32> to vector<16x128xf32>
    %237 = arith.mulf %234, %236 : vector<16x128xf32>
    %238 = arith.addf %227, %237 : vector<16x128xf32>
    %239 = arith.mulf %66, %238 : vector<16x128xf32>
    %240 = arith.truncf %239 : vector<16x128xf32> to vector<16x128xbf16>
    %c0_69 = arith.constant 0 : index
    %c0_70 = arith.constant 0 : index
    %c0_71 = arith.constant 0 : index
    %241 = vector.load %arg13[%c0_69, %c0_70, %c0_71] : memref<2x128x128xbf16, #tpu.memory_space<vmem>>, vector<1x128x128xbf16>
    %242 = vector.shape_cast %241 : vector<1x128x128xbf16> to vector<128x128xbf16>
    %cst_72 = arith.constant dense<0.000000e+00> : vector<16x128xf32>
    %243 = tpu.matmul %240, %242, %cst_72 {dimension_numbers = #tpu.dot_dimension_numbers<[1], [0], [0], [1], [0, 0, 1, 1], [], []>} : vector<16x128xbf16>, vector<128x128xbf16>, vector<16x128xf32> -> vector<16x128xf32>
    %c0_73 = arith.constant 0 : index
    %c0_74 = arith.constant 0 : index
    %c0_75 = arith.constant 0 : index
    %244 = vector.load %arg14[%c0_73, %c0_74, %c0_75] : memref<2x1x128xf32, #tpu.memory_space<vmem>>, vector<1x1x128xf32>
    %245 = vector.shape_cast %244 : vector<1x1x128xf32> to vector<1x128xf32>
    %246 = vector.broadcast %245 : vector<1x128xf32> to vector<16x128xf32>
    %247 = arith.addf %243, %246 : vector<16x128xf32>
    %248 = arith.addf %29, %247 : vector<16x128xf32>
    %cst_76 = arith.constant dense<0.000000e+00> : vector<16xf32>
    %249 = vector.multi_reduction <add>, %248, %cst_76 [1] : vector<16x128xf32> to vector<16xf32>
    %250 = vector.shape_cast %249 : vector<16xf32> to vector<16x1xf32>
    %cst_77 = arith.constant 1.280000e+02 : f32
    %251 = vector.broadcast %cst_77 : f32 to vector<16x1xf32>
    %252 = arith.divf %250, %251 : vector<16x1xf32>
    %253 = vector.broadcast %252 : vector<16x1xf32> to vector<16x128xf32>
    %254 = arith.subf %248, %253 : vector<16x128xf32>
    %255 = arith.mulf %254, %254 : vector<16x128xf32>
    %cst_78 = arith.constant dense<0.000000e+00> : vector<16xf32>
    %256 = vector.multi_reduction <add>, %255, %cst_78 [1] : vector<16x128xf32> to vector<16xf32>
    %257 = vector.shape_cast %256 : vector<16xf32> to vector<16x1xf32>
    %cst_79 = arith.constant 1.280000e+02 : f32
    %258 = vector.broadcast %cst_79 : f32 to vector<16x1xf32>
    %259 = arith.divf %257, %258 : vector<16x1xf32>
    %260 = vector.broadcast %252 : vector<16x1xf32> to vector<16x128xf32>
    %261 = arith.subf %248, %260 : vector<16x128xf32>
    %cst_80 = arith.constant 9.99999974E-6 : f32
    %262 = vector.broadcast %cst_80 : f32 to vector<16x1xf32>
    %263 = arith.addf %259, %262 : vector<16x1xf32>
    %264 = math.rsqrt %263 : vector<16x1xf32>
    %265 = vector.broadcast %264 : vector<16x1xf32> to vector<16x128xf32>
    %266 = arith.mulf %261, %265 : vector<16x128xf32>
    %c1 = arith.constant 1 : index
    %c0_81 = arith.constant 0 : index
    %c0_82 = arith.constant 0 : index
    %267 = vector.load %arg8[%c1, %c0_81, %c0_82] : memref<2x1x128xf32, #tpu.memory_space<vmem>>, vector<1x1x128xf32>
    %268 = vector.shape_cast %267 : vector<1x1x128xf32> to vector<1x128xf32>
    %269 = vector.broadcast %268 : vector<1x128xf32> to vector<16x128xf32>
    %270 = arith.mulf %266, %269 : vector<16x128xf32>
    %c1_83 = arith.constant 1 : index
    %c0_84 = arith.constant 0 : index
    %c0_85 = arith.constant 0 : index
    %271 = vector.load %arg9[%c1_83, %c0_84, %c0_85] : memref<2x1x128xf32, #tpu.memory_space<vmem>>, vector<1x1x128xf32>
    %272 = vector.shape_cast %271 : vector<1x1x128xf32> to vector<1x128xf32>
    %273 = vector.broadcast %272 : vector<1x128xf32> to vector<16x128xf32>
    %274 = arith.addf %270, %273 : vector<16x128xf32>
    %275 = arith.truncf %274 : vector<16x128xf32> to vector<16x128xbf16>
    %c1_86 = arith.constant 1 : index
    %c0_87 = arith.constant 0 : index
    %c0_88 = arith.constant 0 : index
    %276 = vector.load %arg10[%c1_86, %c0_87, %c0_88] : memref<2x128x384xbf16, #tpu.memory_space<vmem>>, vector<1x128x384xbf16>
    %277 = vector.shape_cast %276 : vector<1x128x384xbf16> to vector<128x384xbf16>
    %cst_89 = arith.constant dense<0.000000e+00> : vector<16x384xf32>
    %278 = tpu.matmul %275, %277, %cst_89 {dimension_numbers = #tpu.dot_dimension_numbers<[1], [0], [0], [1], [0, 0, 1, 1], [], []>} : vector<16x128xbf16>, vector<128x384xbf16>, vector<16x384xf32> -> vector<16x384xf32>
    %c1_90 = arith.constant 1 : index
    %c0_91 = arith.constant 0 : index
    %c0_92 = arith.constant 0 : index
    %279 = vector.load %arg11[%c1_90, %c0_91, %c0_92] : memref<2x1x384xf32, #tpu.memory_space<vmem>>, vector<1x1x384xf32>
    %280 = vector.shape_cast %279 : vector<1x1x384xf32> to vector<1x384xf32>
    %281 = vector.broadcast %280 : vector<1x384xf32> to vector<16x384xf32>
    %282 = arith.addf %278, %281 : vector<16x384xf32>
    %283 = vector.extract_strided_slice %282 {offsets = [0, 0], sizes = [16, 128], strides = [1, 1]} : vector<16x384xf32> to vector<16x128xf32>
    %284 = vector.extract_strided_slice %282 {offsets = [0, 128], sizes = [16, 128], strides = [1, 1]} : vector<16x384xf32> to vector<16x128xf32>
    %285 = vector.extract_strided_slice %282 {offsets = [0, 256], sizes = [16, 128], strides = [1, 1]} : vector<16x384xf32> to vector<16x128xf32>
    %286 = arith.mulf %283, %285 : vector<16x128xf32>
    %c1_93 = arith.constant 1 : index
    %c0_94 = arith.constant 0 : index
    %c0_95 = arith.constant 0 : index
    %287 = vector.load %arg12[%c1_93, %c0_94, %c0_95] : memref<2x16x128xf32, #tpu.memory_space<vmem>>, vector<1x16x128xf32>
    %288 = vector.shape_cast %287 : vector<1x16x128xf32> to vector<16x128xf32>
    %289 = vector.extract_strided_slice %288 {offsets = [0, 0], sizes = [1, 128], strides = [1, 1]} : vector<16x128xf32> to vector<1x128xf32>
    %290 = vector.broadcast %289 : vector<1x128xf32> to vector<16x128xf32>
    %291 = arith.mulf %286, %290 : vector<16x128xf32>
    %c1_i32_96 = arith.constant 1 : i32
    %292 = tpu.dynamic_rotate %286 by %c1_i32_96 dim 0 : vector<16x128xf32>, i32 -> vector<16x128xf32>
    %c1_i32_97 = arith.constant 1 : i32
    %293 = vector.broadcast %c1_i32_97 : i32 to vector<16x1xi32>
    %294 = arith.cmpi sge, %30, %293 : vector<16x1xi32>
    %cst_98 = arith.constant 0.000000e+00 : f32
    %295 = vector.shape_cast %294 : vector<16x1xi1> to vector<16x1xi1>
    %296 = vector.broadcast %295 : vector<16x1xi1> to vector<16x128xi1>
    %297 = vector.broadcast %cst_98 : f32 to vector<16x128xf32>
    %298 = arith.select %296, %292, %297 : vector<16x128xi1>, vector<16x128xf32>
    %299 = vector.extract_strided_slice %288 {offsets = [1, 0], sizes = [1, 128], strides = [1, 1]} : vector<16x128xf32> to vector<1x128xf32>
    %300 = vector.broadcast %299 : vector<1x128xf32> to vector<16x128xf32>
    %301 = arith.mulf %298, %300 : vector<16x128xf32>
    %302 = arith.addf %291, %301 : vector<16x128xf32>
    %c2_i32_99 = arith.constant 2 : i32
    %303 = tpu.dynamic_rotate %286 by %c2_i32_99 dim 0 : vector<16x128xf32>, i32 -> vector<16x128xf32>
    %c2_i32_100 = arith.constant 2 : i32
    %304 = vector.broadcast %c2_i32_100 : i32 to vector<16x1xi32>
    %305 = arith.cmpi sge, %30, %304 : vector<16x1xi32>
    %cst_101 = arith.constant 0.000000e+00 : f32
    %306 = vector.shape_cast %305 : vector<16x1xi1> to vector<16x1xi1>
    %307 = vector.broadcast %306 : vector<16x1xi1> to vector<16x128xi1>
    %308 = vector.broadcast %cst_101 : f32 to vector<16x128xf32>
    %309 = arith.select %307, %303, %308 : vector<16x128xi1>, vector<16x128xf32>
    %310 = vector.extract_strided_slice %288 {offsets = [2, 0], sizes = [1, 128], strides = [1, 1]} : vector<16x128xf32> to vector<1x128xf32>
    %311 = vector.broadcast %310 : vector<1x128xf32> to vector<16x128xf32>
    %312 = arith.mulf %309, %311 : vector<16x128xf32>
    %313 = arith.addf %302, %312 : vector<16x128xf32>
    %c3_i32_102 = arith.constant 3 : i32
    %314 = tpu.dynamic_rotate %286 by %c3_i32_102 dim 0 : vector<16x128xf32>, i32 -> vector<16x128xf32>
    %c3_i32_103 = arith.constant 3 : i32
    %315 = vector.broadcast %c3_i32_103 : i32 to vector<16x1xi32>
    %316 = arith.cmpi sge, %30, %315 : vector<16x1xi32>
    %cst_104 = arith.constant 0.000000e+00 : f32
    %317 = vector.shape_cast %316 : vector<16x1xi1> to vector<16x1xi1>
    %318 = vector.broadcast %317 : vector<16x1xi1> to vector<16x128xi1>
    %319 = vector.broadcast %cst_104 : f32 to vector<16x128xf32>
    %320 = arith.select %318, %314, %319 : vector<16x128xi1>, vector<16x128xf32>
    %321 = vector.extract_strided_slice %288 {offsets = [3, 0], sizes = [1, 128], strides = [1, 1]} : vector<16x128xf32> to vector<1x128xf32>
    %322 = vector.broadcast %321 : vector<1x128xf32> to vector<16x128xf32>
    %323 = arith.mulf %320, %322 : vector<16x128xf32>
    %324 = arith.addf %313, %323 : vector<16x128xf32>
    %c4_i32_105 = arith.constant 4 : i32
    %325 = tpu.dynamic_rotate %286 by %c4_i32_105 dim 0 : vector<16x128xf32>, i32 -> vector<16x128xf32>
    %c4_i32_106 = arith.constant 4 : i32
    %326 = vector.broadcast %c4_i32_106 : i32 to vector<16x1xi32>
    %327 = arith.cmpi sge, %30, %326 : vector<16x1xi32>
    %cst_107 = arith.constant 0.000000e+00 : f32
    %328 = vector.shape_cast %327 : vector<16x1xi1> to vector<16x1xi1>
    %329 = vector.broadcast %328 : vector<16x1xi1> to vector<16x128xi1>
    %330 = vector.broadcast %cst_107 : f32 to vector<16x128xf32>
    %331 = arith.select %329, %325, %330 : vector<16x128xi1>, vector<16x128xf32>
    %332 = vector.extract_strided_slice %288 {offsets = [4, 0], sizes = [1, 128], strides = [1, 1]} : vector<16x128xf32> to vector<1x128xf32>
    %333 = vector.broadcast %332 : vector<1x128xf32> to vector<16x128xf32>
    %334 = arith.mulf %331, %333 : vector<16x128xf32>
    %335 = arith.addf %324, %334 : vector<16x128xf32>
    %c5_i32_108 = arith.constant 5 : i32
    %336 = tpu.dynamic_rotate %286 by %c5_i32_108 dim 0 : vector<16x128xf32>, i32 -> vector<16x128xf32>
    %c5_i32_109 = arith.constant 5 : i32
    %337 = vector.broadcast %c5_i32_109 : i32 to vector<16x1xi32>
    %338 = arith.cmpi sge, %30, %337 : vector<16x1xi32>
    %cst_110 = arith.constant 0.000000e+00 : f32
    %339 = vector.shape_cast %338 : vector<16x1xi1> to vector<16x1xi1>
    %340 = vector.broadcast %339 : vector<16x1xi1> to vector<16x128xi1>
    %341 = vector.broadcast %cst_110 : f32 to vector<16x128xf32>
    %342 = arith.select %340, %336, %341 : vector<16x128xi1>, vector<16x128xf32>
    %343 = vector.extract_strided_slice %288 {offsets = [5, 0], sizes = [1, 128], strides = [1, 1]} : vector<16x128xf32> to vector<1x128xf32>
    %344 = vector.broadcast %343 : vector<1x128xf32> to vector<16x128xf32>
    %345 = arith.mulf %342, %344 : vector<16x128xf32>
    %346 = arith.addf %335, %345 : vector<16x128xf32>
    %c6_i32_111 = arith.constant 6 : i32
    %347 = tpu.dynamic_rotate %286 by %c6_i32_111 dim 0 : vector<16x128xf32>, i32 -> vector<16x128xf32>
    %c6_i32_112 = arith.constant 6 : i32
    %348 = vector.broadcast %c6_i32_112 : i32 to vector<16x1xi32>
    %349 = arith.cmpi sge, %30, %348 : vector<16x1xi32>
    %cst_113 = arith.constant 0.000000e+00 : f32
    %350 = vector.shape_cast %349 : vector<16x1xi1> to vector<16x1xi1>
    %351 = vector.broadcast %350 : vector<16x1xi1> to vector<16x128xi1>
    %352 = vector.broadcast %cst_113 : f32 to vector<16x128xf32>
    %353 = arith.select %351, %347, %352 : vector<16x128xi1>, vector<16x128xf32>
    %354 = vector.extract_strided_slice %288 {offsets = [6, 0], sizes = [1, 128], strides = [1, 1]} : vector<16x128xf32> to vector<1x128xf32>
    %355 = vector.broadcast %354 : vector<1x128xf32> to vector<16x128xf32>
    %356 = arith.mulf %353, %355 : vector<16x128xf32>
    %357 = arith.addf %346, %356 : vector<16x128xf32>
    %c7_i32_114 = arith.constant 7 : i32
    %358 = tpu.dynamic_rotate %286 by %c7_i32_114 dim 0 : vector<16x128xf32>, i32 -> vector<16x128xf32>
    %c7_i32_115 = arith.constant 7 : i32
    %359 = vector.broadcast %c7_i32_115 : i32 to vector<16x1xi32>
    %360 = arith.cmpi sge, %30, %359 : vector<16x1xi32>
    %cst_116 = arith.constant 0.000000e+00 : f32
    %361 = vector.shape_cast %360 : vector<16x1xi1> to vector<16x1xi1>
    %362 = vector.broadcast %361 : vector<16x1xi1> to vector<16x128xi1>
    %363 = vector.broadcast %cst_116 : f32 to vector<16x128xf32>
    %364 = arith.select %362, %358, %363 : vector<16x128xi1>, vector<16x128xf32>
    %365 = vector.extract_strided_slice %288 {offsets = [7, 0], sizes = [1, 128], strides = [1, 1]} : vector<16x128xf32> to vector<1x128xf32>
    %366 = vector.broadcast %365 : vector<1x128xf32> to vector<16x128xf32>
    %367 = arith.mulf %364, %366 : vector<16x128xf32>
    %368 = arith.addf %357, %367 : vector<16x128xf32>
    %c8_i32_117 = arith.constant 8 : i32
    %369 = tpu.dynamic_rotate %286 by %c8_i32_117 dim 0 : vector<16x128xf32>, i32 -> vector<16x128xf32>
    %c8_i32_118 = arith.constant 8 : i32
    %370 = vector.broadcast %c8_i32_118 : i32 to vector<16x1xi32>
    %371 = arith.cmpi sge, %30, %370 : vector<16x1xi32>
    %cst_119 = arith.constant 0.000000e+00 : f32
    %372 = vector.shape_cast %371 : vector<16x1xi1> to vector<16x1xi1>
    %373 = vector.broadcast %372 : vector<16x1xi1> to vector<16x128xi1>
    %374 = vector.broadcast %cst_119 : f32 to vector<16x128xf32>
    %375 = arith.select %373, %369, %374 : vector<16x128xi1>, vector<16x128xf32>
    %376 = vector.extract_strided_slice %288 {offsets = [8, 0], sizes = [1, 128], strides = [1, 1]} : vector<16x128xf32> to vector<1x128xf32>
    %377 = vector.broadcast %376 : vector<1x128xf32> to vector<16x128xf32>
    %378 = arith.mulf %375, %377 : vector<16x128xf32>
    %379 = arith.addf %368, %378 : vector<16x128xf32>
    %c9_i32_120 = arith.constant 9 : i32
    %380 = tpu.dynamic_rotate %286 by %c9_i32_120 dim 0 : vector<16x128xf32>, i32 -> vector<16x128xf32>
    %c9_i32_121 = arith.constant 9 : i32
    %381 = vector.broadcast %c9_i32_121 : i32 to vector<16x1xi32>
    %382 = arith.cmpi sge, %30, %381 : vector<16x1xi32>
    %cst_122 = arith.constant 0.000000e+00 : f32
    %383 = vector.shape_cast %382 : vector<16x1xi1> to vector<16x1xi1>
    %384 = vector.broadcast %383 : vector<16x1xi1> to vector<16x128xi1>
    %385 = vector.broadcast %cst_122 : f32 to vector<16x128xf32>
    %386 = arith.select %384, %380, %385 : vector<16x128xi1>, vector<16x128xf32>
    %387 = vector.extract_strided_slice %288 {offsets = [9, 0], sizes = [1, 128], strides = [1, 1]} : vector<16x128xf32> to vector<1x128xf32>
    %388 = vector.broadcast %387 : vector<1x128xf32> to vector<16x128xf32>
    %389 = arith.mulf %386, %388 : vector<16x128xf32>
    %390 = arith.addf %379, %389 : vector<16x128xf32>
    %c10_i32_123 = arith.constant 10 : i32
    %391 = tpu.dynamic_rotate %286 by %c10_i32_123 dim 0 : vector<16x128xf32>, i32 -> vector<16x128xf32>
    %c10_i32_124 = arith.constant 10 : i32
    %392 = vector.broadcast %c10_i32_124 : i32 to vector<16x1xi32>
    %393 = arith.cmpi sge, %30, %392 : vector<16x1xi32>
    %cst_125 = arith.constant 0.000000e+00 : f32
    %394 = vector.shape_cast %393 : vector<16x1xi1> to vector<16x1xi1>
    %395 = vector.broadcast %394 : vector<16x1xi1> to vector<16x128xi1>
    %396 = vector.broadcast %cst_125 : f32 to vector<16x128xf32>
    %397 = arith.select %395, %391, %396 : vector<16x128xi1>, vector<16x128xf32>
    %398 = vector.extract_strided_slice %288 {offsets = [10, 0], sizes = [1, 128], strides = [1, 1]} : vector<16x128xf32> to vector<1x128xf32>
    %399 = vector.broadcast %398 : vector<1x128xf32> to vector<16x128xf32>
    %400 = arith.mulf %397, %399 : vector<16x128xf32>
    %401 = arith.addf %390, %400 : vector<16x128xf32>
    %c11_i32_126 = arith.constant 11 : i32
    %402 = tpu.dynamic_rotate %286 by %c11_i32_126 dim 0 : vector<16x128xf32>, i32 -> vector<16x128xf32>
    %c11_i32_127 = arith.constant 11 : i32
    %403 = vector.broadcast %c11_i32_127 : i32 to vector<16x1xi32>
    %404 = arith.cmpi sge, %30, %403 : vector<16x1xi32>
    %cst_128 = arith.constant 0.000000e+00 : f32
    %405 = vector.shape_cast %404 : vector<16x1xi1> to vector<16x1xi1>
    %406 = vector.broadcast %405 : vector<16x1xi1> to vector<16x128xi1>
    %407 = vector.broadcast %cst_128 : f32 to vector<16x128xf32>
    %408 = arith.select %406, %402, %407 : vector<16x128xi1>, vector<16x128xf32>
    %409 = vector.extract_strided_slice %288 {offsets = [11, 0], sizes = [1, 128], strides = [1, 1]} : vector<16x128xf32> to vector<1x128xf32>
    %410 = vector.broadcast %409 : vector<1x128xf32> to vector<16x128xf32>
    %411 = arith.mulf %408, %410 : vector<16x128xf32>
    %412 = arith.addf %401, %411 : vector<16x128xf32>
    %c12_i32_129 = arith.constant 12 : i32
    %413 = tpu.dynamic_rotate %286 by %c12_i32_129 dim 0 : vector<16x128xf32>, i32 -> vector<16x128xf32>
    %c12_i32_130 = arith.constant 12 : i32
    %414 = vector.broadcast %c12_i32_130 : i32 to vector<16x1xi32>
    %415 = arith.cmpi sge, %30, %414 : vector<16x1xi32>
    %cst_131 = arith.constant 0.000000e+00 : f32
    %416 = vector.shape_cast %415 : vector<16x1xi1> to vector<16x1xi1>
    %417 = vector.broadcast %416 : vector<16x1xi1> to vector<16x128xi1>
    %418 = vector.broadcast %cst_131 : f32 to vector<16x128xf32>
    %419 = arith.select %417, %413, %418 : vector<16x128xi1>, vector<16x128xf32>
    %420 = vector.extract_strided_slice %288 {offsets = [12, 0], sizes = [1, 128], strides = [1, 1]} : vector<16x128xf32> to vector<1x128xf32>
    %421 = vector.broadcast %420 : vector<1x128xf32> to vector<16x128xf32>
    %422 = arith.mulf %419, %421 : vector<16x128xf32>
    %423 = arith.addf %412, %422 : vector<16x128xf32>
    %c13_i32_132 = arith.constant 13 : i32
    %424 = tpu.dynamic_rotate %286 by %c13_i32_132 dim 0 : vector<16x128xf32>, i32 -> vector<16x128xf32>
    %c13_i32_133 = arith.constant 13 : i32
    %425 = vector.broadcast %c13_i32_133 : i32 to vector<16x1xi32>
    %426 = arith.cmpi sge, %30, %425 : vector<16x1xi32>
    %cst_134 = arith.constant 0.000000e+00 : f32
    %427 = vector.shape_cast %426 : vector<16x1xi1> to vector<16x1xi1>
    %428 = vector.broadcast %427 : vector<16x1xi1> to vector<16x128xi1>
    %429 = vector.broadcast %cst_134 : f32 to vector<16x128xf32>
    %430 = arith.select %428, %424, %429 : vector<16x128xi1>, vector<16x128xf32>
    %431 = vector.extract_strided_slice %288 {offsets = [13, 0], sizes = [1, 128], strides = [1, 1]} : vector<16x128xf32> to vector<1x128xf32>
    %432 = vector.broadcast %431 : vector<1x128xf32> to vector<16x128xf32>
    %433 = arith.mulf %430, %432 : vector<16x128xf32>
    %434 = arith.addf %423, %433 : vector<16x128xf32>
    %c14_i32_135 = arith.constant 14 : i32
    %435 = tpu.dynamic_rotate %286 by %c14_i32_135 dim 0 : vector<16x128xf32>, i32 -> vector<16x128xf32>
    %c14_i32_136 = arith.constant 14 : i32
    %436 = vector.broadcast %c14_i32_136 : i32 to vector<16x1xi32>
    %437 = arith.cmpi sge, %30, %436 : vector<16x1xi32>
    %cst_137 = arith.constant 0.000000e+00 : f32
    %438 = vector.shape_cast %437 : vector<16x1xi1> to vector<16x1xi1>
    %439 = vector.broadcast %438 : vector<16x1xi1> to vector<16x128xi1>
    %440 = vector.broadcast %cst_137 : f32 to vector<16x128xf32>
    %441 = arith.select %439, %435, %440 : vector<16x128xi1>, vector<16x128xf32>
    %442 = vector.extract_strided_slice %288 {offsets = [14, 0], sizes = [1, 128], strides = [1, 1]} : vector<16x128xf32> to vector<1x128xf32>
    %443 = vector.broadcast %442 : vector<1x128xf32> to vector<16x128xf32>
    %444 = arith.mulf %441, %443 : vector<16x128xf32>
    %445 = arith.addf %434, %444 : vector<16x128xf32>
    %c15_i32_138 = arith.constant 15 : i32
    %446 = tpu.dynamic_rotate %286 by %c15_i32_138 dim 0 : vector<16x128xf32>, i32 -> vector<16x128xf32>
    %c15_i32_139 = arith.constant 15 : i32
    %447 = vector.broadcast %c15_i32_139 : i32 to vector<16x1xi32>
    %448 = arith.cmpi sge, %30, %447 : vector<16x1xi32>
    %cst_140 = arith.constant 0.000000e+00 : f32
    %449 = vector.shape_cast %448 : vector<16x1xi1> to vector<16x1xi1>
    %450 = vector.broadcast %449 : vector<16x1xi1> to vector<16x128xi1>
    %451 = vector.broadcast %cst_140 : f32 to vector<16x128xf32>
    %452 = arith.select %450, %446, %451 : vector<16x128xi1>, vector<16x128xf32>
    %453 = vector.extract_strided_slice %288 {offsets = [15, 0], sizes = [1, 128], strides = [1, 1]} : vector<16x128xf32> to vector<1x128xf32>
    %454 = vector.broadcast %453 : vector<1x128xf32> to vector<16x128xf32>
    %455 = arith.mulf %452, %454 : vector<16x128xf32>
    %456 = arith.addf %445, %455 : vector<16x128xf32>
    %457 = arith.mulf %284, %456 : vector<16x128xf32>
    %458 = arith.truncf %457 : vector<16x128xf32> to vector<16x128xbf16>
    %c1_141 = arith.constant 1 : index
    %c0_142 = arith.constant 0 : index
    %c0_143 = arith.constant 0 : index
    %459 = vector.load %arg13[%c1_141, %c0_142, %c0_143] : memref<2x128x128xbf16, #tpu.memory_space<vmem>>, vector<1x128x128xbf16>
    %460 = vector.shape_cast %459 : vector<1x128x128xbf16> to vector<128x128xbf16>
    %cst_144 = arith.constant dense<0.000000e+00> : vector<16x128xf32>
    %461 = tpu.matmul %458, %460, %cst_144 {dimension_numbers = #tpu.dot_dimension_numbers<[1], [0], [0], [1], [0, 0, 1, 1], [], []>} : vector<16x128xbf16>, vector<128x128xbf16>, vector<16x128xf32> -> vector<16x128xf32>
    %c1_145 = arith.constant 1 : index
    %c0_146 = arith.constant 0 : index
    %c0_147 = arith.constant 0 : index
    %462 = vector.load %arg14[%c1_145, %c0_146, %c0_147] : memref<2x1x128xf32, #tpu.memory_space<vmem>>, vector<1x1x128xf32>
    %463 = vector.shape_cast %462 : vector<1x1x128xf32> to vector<1x128xf32>
    %464 = vector.broadcast %463 : vector<1x128xf32> to vector<16x128xf32>
    %465 = arith.addf %461, %464 : vector<16x128xf32>
    %466 = arith.addf %248, %465 : vector<16x128xf32>
    %c0_148 = arith.constant 0 : index
    %c0_149 = arith.constant 0 : index
    %c0_150 = arith.constant 0 : index
    %467 = vector.load %arg21[%c0_148, %c0_149, %c0_150] : memref<1x16x128xf32, #tpu.memory_space<vmem>>, vector<1x16x128xf32>
    %468 = vector.shape_cast %467 : vector<1x16x128xf32> to vector<16x128xf32>
    %469 = vector.shape_cast %466 : vector<16x128xf32> to vector<1x16x128xf32>
    tpu.vector_store %arg21[%c0_148, %c0_149, %c0_150], %469 {strides = array<i32>} : memref<1x16x128xf32, #tpu.memory_space<vmem>>, vector<1x16x128xf32>,
    %cst_151 = arith.constant dense<0.000000e+00> : vector<128xf32>
    %470 = vector.multi_reduction <add>, %466, %cst_151 [0] : vector<16x128xf32> to vector<128xf32>
    %471 = vector.shape_cast %470 : vector<128xf32> to vector<1x128xf32>
    %cst_152 = arith.constant 1.600000e+01 : f32
    %472 = vector.broadcast %cst_152 : f32 to vector<1x128xf32>
    %473 = arith.divf %471, %472 : vector<1x128xf32>
    %c0_153 = arith.constant 0 : index
    %c0_154 = arith.constant 0 : index
    %c0_155 = arith.constant 0 : index
    %474 = vector.load %arg3[%c0_153, %c0_154, %c0_155] : memref<1x8x128xf32, #tpu.memory_space<vmem>>, vector<1x8x128xf32>
    %475 = vector.shape_cast %474 : vector<1x8x128xf32> to vector<8x128xf32>
    %476 = vector.broadcast %473 : vector<1x128xf32> to vector<8x128xf32>
    %477 = arith.addf %475, %476 : vector<8x128xf32>
    %478 = arith.truncf %477 : vector<8x128xf32> to vector<8x128xbf16>
    %c0_156 = arith.constant 0 : index
    %c0_157 = arith.constant 0 : index
    %479 = vector.load %arg15[%c0_156, %c0_157] : memref<128x128xbf16, #tpu.memory_space<vmem>>, vector<128x128xbf16>
    %cst_158 = arith.constant dense<0.000000e+00> : vector<8x128xf32>
    %480 = tpu.matmul %478, %479, %cst_158 {dimension_numbers = #tpu.dot_dimension_numbers<[1], [0], [0], [1], [0, 0, 1, 1], [], []>} : vector<8x128xbf16>, vector<128x128xbf16>, vector<8x128xf32> -> vector<8x128xf32>
    %c0_159 = arith.constant 0 : index
    %c0_160 = arith.constant 0 : index
    %481 = vector.load %arg16[%c0_159, %c0_160] : memref<1x128xf32, #tpu.memory_space<vmem>>, vector<1x128xf32>
    %482 = vector.broadcast %481 : vector<1x128xf32> to vector<8x128xf32>
    %483 = arith.addf %480, %482 : vector<8x128xf32>
    %484 = arith.mulf %483, %483 : vector<8x128xf32>
    %485 = arith.mulf %483, %484 : vector<8x128xf32>
    %cst_161 = arith.constant 4.471500e-02 : f32
    %486 = vector.broadcast %cst_161 : f32 to vector<8x128xf32>
    %487 = arith.mulf %486, %485 : vector<8x128xf32>
    %488 = arith.addf %483, %487 : vector<8x128xf32>
    %cst_162 = arith.constant 0.797884583 : f32
    %489 = vector.broadcast %cst_162 : f32 to vector<8x128xf32>
    %490 = arith.mulf %489, %488 : vector<8x128xf32>
    %491 = math.tanh %490 : vector<8x128xf32>
    %cst_163 = arith.constant 1.000000e+00 : f32
    %492 = vector.broadcast %cst_163 : f32 to vector<8x128xf32>
    %493 = arith.addf %492, %491 : vector<8x128xf32>
    %cst_164 = arith.constant 5.000000e-01 : f32
    %494 = vector.broadcast %cst_164 : f32 to vector<8x128xf32>
    %495 = arith.mulf %494, %493 : vector<8x128xf32>
    %496 = arith.mulf %483, %495 : vector<8x128xf32>
    %497 = arith.truncf %496 : vector<8x128xf32> to vector<8x128xbf16>
    %c0_165 = arith.constant 0 : index
    %c0_166 = arith.constant 0 : index
    %498 = vector.load %arg17[%c0_165, %c0_166] : memref<128x128xbf16, #tpu.memory_space<vmem>>, vector<128x128xbf16>
    %cst_167 = arith.constant dense<0.000000e+00> : vector<8x128xf32>
    %499 = tpu.matmul %497, %498, %cst_167 {dimension_numbers = #tpu.dot_dimension_numbers<[1], [0], [0], [1], [0, 0, 1, 1], [], []>} : vector<8x128xbf16>, vector<128x128xbf16>, vector<8x128xf32> -> vector<8x128xf32>
    %c0_168 = arith.constant 0 : index
    %c0_169 = arith.constant 0 : index
    %500 = vector.load %arg18[%c0_168, %c0_169] : memref<1x128xf32, #tpu.memory_space<vmem>>, vector<1x128xf32>
    %501 = vector.broadcast %500 : vector<1x128xf32> to vector<8x128xf32>
    %502 = arith.addf %499, %501 : vector<8x128xf32>
    %503 = arith.mulf %502, %502 : vector<8x128xf32>
    %504 = arith.mulf %502, %503 : vector<8x128xf32>
    %cst_170 = arith.constant 4.471500e-02 : f32
    %505 = vector.broadcast %cst_170 : f32 to vector<8x128xf32>
    %506 = arith.mulf %505, %504 : vector<8x128xf32>
    %507 = arith.addf %502, %506 : vector<8x128xf32>
    %cst_171 = arith.constant 0.797884583 : f32
    %508 = vector.broadcast %cst_171 : f32 to vector<8x128xf32>
    %509 = arith.mulf %508, %507 : vector<8x128xf32>
    %510 = math.tanh %509 : vector<8x128xf32>
    %cst_172 = arith.constant 1.000000e+00 : f32
    %511 = vector.broadcast %cst_172 : f32 to vector<8x128xf32>
    %512 = arith.addf %511, %510 : vector<8x128xf32>
    %cst_173 = arith.constant 5.000000e-01 : f32
    %513 = vector.broadcast %cst_173 : f32 to vector<8x128xf32>
    %514 = arith.mulf %513, %512 : vector<8x128xf32>
    %515 = arith.mulf %502, %514 : vector<8x128xf32>
    %516 = arith.truncf %515 : vector<8x128xf32> to vector<8x128xbf16>
    %c0_174 = arith.constant 0 : index
    %c0_175 = arith.constant 0 : index
    %517 = vector.load %arg19[%c0_174, %c0_175] : memref<128x128xbf16, #tpu.memory_space<vmem>>, vector<128x128xbf16>
    %cst_176 = arith.constant dense<0.000000e+00> : vector<8x128xf32>
    %518 = tpu.matmul %516, %517, %cst_176 {dimension_numbers = #tpu.dot_dimension_numbers<[1], [0], [0], [1], [0, 0, 1, 1], [], []>} : vector<8x128xbf16>, vector<128x128xbf16>, vector<8x128xf32> -> vector<8x128xf32>
    %c0_177 = arith.constant 0 : index
    %c0_178 = arith.constant 0 : index
    %519 = vector.load %arg20[%c0_177, %c0_178] : memref<1x128xf32, #tpu.memory_space<vmem>>, vector<1x128xf32>
    %520 = vector.broadcast %519 : vector<1x128xf32> to vector<8x128xf32>
    %521 = arith.addf %518, %520 : vector<8x128xf32>
    %c0_179 = arith.constant 0 : index
    %c0_180 = arith.constant 0 : index
    %c0_181 = arith.constant 0 : index
    %522 = vector.load %arg22[%c0_179, %c0_180, %c0_181] : memref<1x8x128xf32, #tpu.memory_space<vmem>>, vector<1x8x128xf32>
    %523 = vector.shape_cast %522 : vector<1x8x128xf32> to vector<8x128xf32>
    %524 = vector.shape_cast %521 : vector<8x128xf32> to vector<1x8x128xf32>
    tpu.vector_store %arg22[%c0_179, %c0_180, %c0_181], %524 {strides = array<i32>} : memref<1x8x128xf32, #tpu.memory_space<vmem>>, vector<1x8x128xf32>,
    return
  }
  func.func @transform_0(%arg0: i32) -> (i32, i32, i32) {
    %c0_i32 = arith.constant 0 : i32
    %c0_i32_0 = arith.constant 0 : i32
    %c0_i32_1 = arith.constant 0 : i32
    return %arg0, %c0_i32, %c0_i32_0 : i32, i32, i32
  }
  func.func @transform_1(%arg0: i32) -> (i32, i32, i32) {
    %c0_i32 = arith.constant 0 : i32
    %c0_i32_0 = arith.constant 0 : i32
    %c0_i32_1 = arith.constant 0 : i32
    return %arg0, %c0_i32, %c0_i32_0 : i32, i32, i32
  }
  func.func @transform_2(%arg0: i32) -> (i32, i32, i32) {
    %c0_i32 = arith.constant 0 : i32
    %c0_i32_0 = arith.constant 0 : i32
    %c0_i32_1 = arith.constant 0 : i32
    return %arg0, %c0_i32, %c0_i32_0 : i32, i32, i32
  }
  func.func @transform_3(%arg0: i32) -> (i32, i32) {
    %c0_i32 = arith.constant 0 : i32
    %c0_i32_0 = arith.constant 0 : i32
    %c0_i32_1 = arith.constant 0 : i32
    return %c0_i32, %c0_i32_0 : i32, i32
  }
  func.func @transform_4(%arg0: i32) -> (i32, i32) {
    %c0_i32 = arith.constant 0 : i32
    %c0_i32_0 = arith.constant 0 : i32
    %c0_i32_1 = arith.constant 0 : i32
    return %c0_i32, %c0_i32_0 : i32, i32
  }
  func.func @transform_5(%arg0: i32) -> (i32, i32) {
    %c0_i32 = arith.constant 0 : i32
    %c0_i32_0 = arith.constant 0 : i32
    %c0_i32_1 = arith.constant 0 : i32
    return %c0_i32, %c0_i32_0 : i32, i32
  }
  func.func @transform_6(%arg0: i32) -> (i32, i32) {
    %c0_i32 = arith.constant 0 : i32
    %c0_i32_0 = arith.constant 0 : i32
    %c0_i32_1 = arith.constant 0 : i32
    return %c0_i32, %c0_i32_0 : i32, i32
  }
  func.func @transform_7(%arg0: i32) -> (i32, i32, i32) {
    %c0_i32 = arith.constant 0 : i32
    %c0_i32_0 = arith.constant 0 : i32
    %c0_i32_1 = arith.constant 0 : i32
    %c0_i32_2 = arith.constant 0 : i32
    return %c0_i32, %c0_i32_0, %c0_i32_1 : i32, i32, i32
  }
  func.func @transform_8(%arg0: i32) -> (i32, i32, i32) {
    %c0_i32 = arith.constant 0 : i32
    %c0_i32_0 = arith.constant 0 : i32
    %c0_i32_1 = arith.constant 0 : i32
    %c0_i32_2 = arith.constant 0 : i32
    return %c0_i32, %c0_i32_0, %c0_i32_1 : i32, i32, i32
  }
  func.func @transform_9(%arg0: i32) -> (i32, i32, i32) {
    %c0_i32 = arith.constant 0 : i32
    %c0_i32_0 = arith.constant 0 : i32
    %c0_i32_1 = arith.constant 0 : i32
    %c0_i32_2 = arith.constant 0 : i32
    return %c0_i32, %c0_i32_0, %c0_i32_1 : i32, i32, i32
  }
  func.func @transform_10(%arg0: i32) -> (i32, i32, i32) {
    %c0_i32 = arith.constant 0 : i32
    %c0_i32_0 = arith.constant 0 : i32
    %c0_i32_1 = arith.constant 0 : i32
    %c0_i32_2 = arith.constant 0 : i32
    return %c0_i32, %c0_i32_0, %c0_i32_1 : i32, i32, i32
  }
  func.func @transform_11(%arg0: i32) -> (i32, i32, i32) {
    %c0_i32 = arith.constant 0 : i32
    %c0_i32_0 = arith.constant 0 : i32
    %c0_i32_1 = arith.constant 0 : i32
    %c0_i32_2 = arith.constant 0 : i32
    return %c0_i32, %c0_i32_0, %c0_i32_1 : i32, i32, i32
  }
  func.func @transform_12(%arg0: i32) -> (i32, i32, i32) {
    %c0_i32 = arith.constant 0 : i32
    %c0_i32_0 = arith.constant 0 : i32
    %c0_i32_1 = arith.constant 0 : i32
    %c0_i32_2 = arith.constant 0 : i32
    return %c0_i32, %c0_i32_0, %c0_i32_1 : i32, i32, i32
  }
  func.func @transform_13(%arg0: i32) -> (i32, i32, i32) {
    %c0_i32 = arith.constant 0 : i32
    %c0_i32_0 = arith.constant 0 : i32
    %c0_i32_1 = arith.constant 0 : i32
    %c0_i32_2 = arith.constant 0 : i32
    return %c0_i32, %c0_i32_0, %c0_i32_1 : i32, i32, i32
  }
  func.func @transform_14(%arg0: i32) -> (i32, i32) {
    %c0_i32 = arith.constant 0 : i32
    %c0_i32_0 = arith.constant 0 : i32
    %c0_i32_1 = arith.constant 0 : i32
    return %c0_i32, %c0_i32_0 : i32, i32
  }
  func.func @transform_15(%arg0: i32) -> (i32, i32) {
    %c0_i32 = arith.constant 0 : i32
    %c0_i32_0 = arith.constant 0 : i32
    %c0_i32_1 = arith.constant 0 : i32
    return %c0_i32, %c0_i32_0 : i32, i32
  }
  func.func @transform_16(%arg0: i32) -> (i32, i32) {
    %c0_i32 = arith.constant 0 : i32
    %c0_i32_0 = arith.constant 0 : i32
    %c0_i32_1 = arith.constant 0 : i32
    return %c0_i32, %c0_i32_0 : i32, i32
  }
  func.func @transform_17(%arg0: i32) -> (i32, i32) {
    %c0_i32 = arith.constant 0 : i32
    %c0_i32_0 = arith.constant 0 : i32
    %c0_i32_1 = arith.constant 0 : i32
    return %c0_i32, %c0_i32_0 : i32, i32
  }
  func.func @transform_18(%arg0: i32) -> (i32, i32) {
    %c0_i32 = arith.constant 0 : i32
    %c0_i32_0 = arith.constant 0 : i32
    %c0_i32_1 = arith.constant 0 : i32
    return %c0_i32, %c0_i32_0 : i32, i32
  }
  func.func @transform_19(%arg0: i32) -> (i32, i32) {
    %c0_i32 = arith.constant 0 : i32
    %c0_i32_0 = arith.constant 0 : i32
    %c0_i32_1 = arith.constant 0 : i32
    return %c0_i32, %c0_i32_0 : i32, i32
  }
  func.func @transform_20(%arg0: i32) -> (i32, i32, i32) {
    %c0_i32 = arith.constant 0 : i32
    %c0_i32_0 = arith.constant 0 : i32
    %c0_i32_1 = arith.constant 0 : i32
    return %arg0, %c0_i32, %c0_i32_0 : i32, i32, i32
  }
  func.func @transform_21(%arg0: i32) -> (i32, i32, i32) {
    %c0_i32 = arith.constant 0 : i32
    %c0_i32_0 = arith.constant 0 : i32
    %c0_i32_1 = arith.constant 0 : i32
    return %arg0, %c0_i32, %c0_i32_0 : i32, i32, i32
  }
}

</mosaic_0001>

<bundles_post_ra>
// kernel: hyena_forward.1
= control target key start
LH: loop header
LB: loop body
LE: loop exit
PB: predicated region body
PF: predicated region fallthrough
CT: control target
= control target key end

     0   :  { %s4491_s0 = inlined_call_operand.vmem [shape: f32[2,16,128], index: 0, kind: input, shape index: {}]   ;;  %s4492_s1 = inlined_call_operand.vmem [shape: f32[2,16,128], index: 1, kind: input, shape index: {}]   ;;  %s4493_s2 = inlined_call_operand.vmem [shape: f32[2,8,128], index: 2, kind: input, shape index: {}]   ;;  %s4494_s3 = inlined_call_operand.vmem [shape: bf16[128,128], index: 3, kind: input, shape index: {}]   ;;  %s4495_s4 = inlined_call_operand.vmem [shape: f32[1,128], index: 4, kind: input, shape index: {}]   ;;  %s4496_s5 = inlined_call_operand.vmem [shape: bf16[128,128], index: 5, kind: input, shape index: {}]   ;;  %s4497_s6 = inlined_call_operand.vmem [shape: f32[1,128], index: 6, kind: input, shape index: {}]   ;;  %s4498_s7 = inlined_call_operand.vmem [shape: f32[2,1,128], index: 7, kind: input, shape index: {}]   ;;  %s4499_s8 = inlined_call_operand.vmem [shape: f32[2,1,128], index: 8, kind: input, shape index: {}]   ;;  %s4500_s9 = inlined_call_operand.vmem [shape: bf16[2,128,384], index: 9, kind: input, shape index: {}]   ;;  %s4501_s10 = inlined_call_operand.vmem [shape: f32[2,1,384], index: 10, kind: input, shape index: {}]   ;;  %s4502_s11 = inlined_call_operand.vmem [shape: f32[2,16,128], index: 11, kind: input, shape index: {}]   ;;  %s4503_s12 = inlined_call_operand.vmem [shape: bf16[2,128,128], index: 12, kind: input, shape index: {}]   ;;  %s4504_s13 = inlined_call_operand.vmem [shape: f32[2,1,128], index: 13, kind: input, shape index: {}]   ;;  %s4505_s14 = inlined_call_operand.vmem [shape: bf16[128,128], index: 14, kind: input, shape index: {}]   ;;  %s4506_s15 = inlined_call_operand.vmem [shape: f32[1,128], index: 15, kind: input, shape index: {}]   ;;  %s4507_s16 = inlined_call_operand.vmem [shape: bf16[128,128], index: 16, kind: input, shape index: {}]   ;;  %s4508_s17 = inlined_call_operand.vmem [shape: f32[1,128], index: 17, kind: input, shape index: {}]   ;;  %s4509_s18 = inlined_call_operand.vmem [shape: bf16[128,128], index: 18, kind: input, shape index: {}]   ;;  %s4510_s19 = inlined_call_operand.vmem [shape: f32[1,128], index: 19, kind: input, shape index: {}]   ;;  %s4511_s20 = inlined_call_operand.hbm [shape: f32[2,16,128], index: 20, kind: output, shape index: {0}]   ;;  %s4512_s21 = inlined_call_operand.vmem [shape: f32[2,8,128], index: 21, kind: output, shape index: {1}]  }
   0x1   :  { %4529 = sst [smem:[#allocation11_spill]] %s4491_s0 }
   0x2   :  { %4530 = sst [smem:[#allocation12_spill]] %s4492_s1 }
   0x3   :  { %4531 = sst [smem:[#allocation13_spill]] %s4493_s2 }
   0x4   :  { %4532 = sst [smem:[#allocation14_spill]] %s4494_s3 }
   0x5   :  { %4533 = sst [smem:[#allocation15_spill]] %s4495_s4 }
   0x6   :  { %4534 = sst [smem:[#allocation16_spill]] %s4496_s5 }
   0x7   :  { %4535 = sst [smem:[#allocation17_spill]] %s4497_s6 }
   0x8   :  { %4536 = sst [smem:[#allocation18_spill]] %s4498_s7 }
   0x9   :  { %4537 = sst [smem:[#allocation19_spill]] %s4499_s8 }
   0xa   :  { %4538 = sst [smem:[#allocation20_spill]] %s4512_s21 }
   0xb   :  { %27 = vsyncpa [#allocation3], 0 }
   0xc   :  { %29 = vsyncpa [#allocation3 + $0x1], 0  ;;  %s3582_s2 = smov 0   ;;  %s3584_s25 = smov 0  }
   0xd   :  { %s3586_s26 = smov 0   ;;  %s3588_s27 = smov 0  }
   0xe LB: > { %4539 = sst [smem:[#allocation5_spill]] %s3452_s2  ;;  %s3603_s3 = sadd.s32 4294967295, %s3464_s27   ;;  %s3464_s27 = sphi %s3588_s27, %s4569_s27   ;;  %s3460_s26 = sphi %s3586_s26, %s4571_s26   ;;  %s3456_s25 = sphi %s3584_s25, %s4573_s25   ;;  %s3452_s2 = sphi %s3582_s2, %s4572_s2  }
   0xf   : > { %4540 = sst [smem:[#allocation6_spill]] %s3460_s26  ;;  %s2775_s28 = sadd.s32 4294967294, %s3464_s27  }
  0x10   : > { %4541 = sst [smem:[#allocation7_spill]] %s3464_s27  ;;  %s3607_s29 = sadd.s32 1, %s3464_s27  }
  0x11   : > { %4542 = sst [smem:[#allocation8_spill]] %s3607_s29  ;;  %s477_s0 = sadd.s32 1, %s3460_s26 }
  0x12   : > { %s474_s4 = ssub.s32 %s3464_s27, %s3607_s29  ;;  %p487_p0 = scmp.ne.s32.totalorder %s3460_s26, %s3456_s25 }
  0x13   : > { %p475_p1 = scmp.eq.s32.totalorder %s474_s4, 0  ;;  %p488_p2 = scmp.eq.s32.totalorder %s3603_s3, 1 }
  0x14   : > { %p493_p3 = scmp.ne.s32.totalorder %s3456_s25, %s3452_s2  ;;  %p494_p4 = scmp.eq.s32.totalorder %s2775_s28, 1 }
  0x15   : > { %s3618_s30 = scalar_select %p475_p1, %s3460_s26, %s477_s0  }
  0x16   : > { %p3620_p5 = por %p488_p2, %p487_p0  ;;  %p3624_p6 = por %p494_p4, %p493_p3 }
  0x17   : > { %4543 = sst [smem:[#allocation9_spill]] %s3618_s30  ;;  %p2778_p7 = scmp.ge.s32.totalorder %s3464_s27, 1 }
  0x18   : > { %s4545_s22 = scalar_select %p3624_p6, 1, 0 }
  0x19   : > { %p612_p8 = scmp.lt.s32.totalorder %s3464_s27, 3 }
  0x1a   : > { %4546 = sst [smem:[#allocation10_spill]] %s4545_s22 }
  0x1b   : > { %p613_p9 = pnand %p2778_p7, %p612_p8 }
  0x1c   : > { %s4547_s24 = sld [smem:[#allocation14_spill]] (!%p613_p9)  ;;  %p685_p10 = scmp.lt.s32.totalorder (!%p613_p9), %s3603_s3, 1 }
  0x1d   : > { %616 = sbr.rel (%p613_p9) target bundleno = 2672 (0xa70), region = 100  ;;  %s4548_s22 = sld [smem:[#allocation12_spill]] (!%p613_p9) }
  0x1e   : > { %s4549_s23 = sld [smem:[#allocation16_spill]] (!%p613_p9) }
  0x1f   : > { %s4550_s29 = sld [smem:[#allocation15_spill]] (!%p613_p9) }
  0x20   : > { %s4551_s1 = sld [smem:[#allocation11_spill]] (!%p613_p9) }
  0x21   : > { %s4552_s6 = sld [smem:[#allocation17_spill]] (!%p613_p9) }
  0x22   : > { %v3268_v0 = vld [vmem:[%s4547_s24 + $0x38] sm:$0xff]   ;;  %v3466_v1 = vmov 0.0   ;;  %v3269_v2 = vld [vmem:[%s4547_s24 + $0x30] sm:$0xff]   ;;  %vm3467_vm0 = vmmov 0   ;;  %v3270_v3 = vld [vmem:[%s4547_s24 + $0x28] sm:$0xff]   ;;  %s3656_s26 = scalar_select %p685_p10, %s3603_s3, 1 }
  0x23   : > { %3044 = vmatprep.subr.bf16.mxu0 %v3466_v1  ;;  %3064 = vmatprep.subr.bf16.mxu1 %v3466_v1  ;;  %v3271_v4 = vld [vmem:[%s4547_s24 + $0x20] sm:$0xff]   ;;  %v3272_v5 = vld [vmem:[%s4547_s24 + $0x18] sm:$0xff]   ;;  %v3273_v6 = vld [vmem:[%s4547_s24 + $0x10] sm:$0xff]   ;;  %s4553_s7 = sld [smem:[#allocation18_spill]] }
  0x24   : > { %3045 = vmatpush3.bf16.msra.mxu0 %v3268_v0  ;;  %3060 = vmatprep.mubr.msk.bf16.mxu0 %vm3467_vm0, %v3466_v1  ;;  %s2960_s30 = sshll.u32 %s3656_s26, 4  ;;  %v3274_v7 = vld [vmem:[%s4547_s24 + $0x8] sm:$0xff]   ;;  %v3275_v8 = vld [vmem:[%s4547_s24] sm:$0xff]   ;;  %v3276_v12 = vld [vmem:[%s4549_s23 + $0x38] sm:$0xff]   ;;  %s4554_s8 = sld [smem:[#allocation19_spill]] }
  0x25   : > { %3046 = vmatprep.subr.bf16.mxu0 %v3466_v1  ;;  %3080 = vmatprep.mubr.msk.bf16.mxu1 %vm3467_vm0, %v3466_v1  ;;  %s694_s2 = scalar_lea.vmem %s4548_s22, %s2960_s30  ;;  %v3277_v13 = vld [vmem:[%s4549_s23 + $0x30] sm:$0xff]   ;;  %v3278_v14 = vld [vmem:[%s4549_s23 + $0x28] sm:$0xff]   ;;  %v3279_v15 = vld [vmem:[%s4549_s23 + $0x20] sm:$0xff]   ;;  %s4528_s28 = sshll.u32 %s3656_s26, 3 }
  0x26   : > { %v704_v9 = vld [vmem:[%s694_s2] sm:$0xff]  ;;  %v705_v10 = vld [vmem:[%s694_s2 + $0x8] sm:$0xff]  ;;  %3065 = vmatpush3.bf16.msra.mxu1 %v3276_v12  ;;  %v3280_v16 = vld [vmem:[%s4549_s23 + $0x18] sm:$0xff]   ;;  %s689_s21 = scalar_lea.vmem %s4551_s1, %s2960_s30  ;;  %s4527_s1 = sand.u32 1, %s3456_s25  }
  0x27   : > { %v706_v11 = vpack.c.bf16 %v705_v10, %v704_v9  ;;  %3066 = vmatprep.subr.bf16.mxu1 %v3466_v1  ;;  %v3281_v17 = vld [vmem:[%s4549_s23 + $0x10] sm:$0xff]   ;;  %v3282_v18 = vld [vmem:[%s4549_s23 + $0x8] sm:$0xff]   ;;  %v3283_v19 = vld [vmem:[%s4549_s23] sm:$0xff]   ;;  %s2779_s27 = sshll.u32 %s4527_s1, 4  ;;  %s4562_s4 = sld [smem:[#allocation13_spill]] }
  0x28   : > { %3047 = vmatpush3.bf16.msra.mxu0 %v3269_v2  ;;  %v2786_v20 = vld [vmem:[%s4550_s29] ss:$0 sm:$0xff]  ;;  %v951_v53 = vld [vmem:[%s689_s21 + $0x8] sm:$0xff]  ;;  %v3287_v59 = vld [vmem:[%s4500_s9 + $0xb0] ss:$12 sps:$4 sm:$0xff]   ;;  %s4351_s30 = scalar_lea.vmem [#allocation2], %s2779_s27 }
  0x29   : > { %3048 = vmatprep.subr.bf16.mxu0 %v3466_v1  ;;  %v2795_v46 = vld [vmem:[%s4552_s6] ss:$0 sm:$0xff]  ;;  %v3284_v57 = vld [vmem:[%s4500_s9 + $0xa8] ss:$12 sps:$4 sm:$0xff]   ;;  %v3286_v58 = vld [vmem:[%s4500_s9 + $0xac] ss:$12 sps:$4 sm:$0xff]  }
  0x2a   : > { %3067 = vmatpush3.bf16.msra.mxu1 %v3277_v13  ;;  %v950_v48 = vld [vmem:[%s689_s21] sm:$0xff]  ;;  %v3299_v13 = vld [vmem:[%s4500_s9 + $0x68] ss:$12 sps:$4 sm:$0xff]   ;;  %s2662_s0 = sshll.u32 %s4351_s30, 4  ;;  %s2962_s29 = sshll.u32 %s3603_s3, 8  ;;  %s4433_s0 = int_to_ptr.vmem [resolvable:$true] %s2662_s0 }
  0x2b   : > { %3068 = vmatprep.subr.bf16.mxu1 %v3466_v1  ;;  %v3292_v9 = vld [vmem:[%s4500_s9 + $0x78] ss:$12 sps:$4 sm:$0xff]   ;;  %v3295_v10 = vld [vmem:[%s4500_s9 + $0x80] ss:$12 sps:$4 sm:$0xff]   ;;  %s4439_s21 = scalar_lea.hbm %s4511_s20, %s2962_s29  ;;  %s4563_s1 = sand.u32 1, %s3456_s25  }
  0x2c   : > { %3049 = vmatpush3.bf16.msra.mxu0 %v3270_v3  ;;  %v3298_v12 = vld [vmem:[%s4500_s9 + $0x64] ss:$12 sps:$4 sm:$0xff]   ;;  %s4443_s2 = scalar_lea.sflag [#allocation3], %s4563_s1  ;;  %s3404_s27 = scalar_lea.vmem %s4433_s0, 256 }
  0x2d   : > { %3050 = vmatprep.subr.bf16.mxu0 %v3466_v1  ;;  %s698_s22 = scalar_lea.vmem %s4562_s4, %s4528_s28  ;;  %p3405_p11 = scmp.ne.s32.totalorder %s4433_s0, %s3404_s27 }
  0x2e   : > { %3069 = vmatpush3.bf16.msra.mxu1 %v3278_v14  ;;  %v3302_v14 = vld [vmem:[%s4500_s9 + $0x4c] ss:$12 sps:$4 sm:$0xff]  }
  0x2f   : > { %3070 = vmatprep.subr.bf16.mxu1 %v3466_v1  ;;  %p3406_p12 = pnand %p3405_p11, %p3620_p5 }
  0x30   : > { %3051 = vmatpush3.bf16.msra.mxu0 %v3271_v4 }
  0x31   : > { %3052 = vmatprep.subr.bf16.mxu0 %v3466_v1  ;;  %p3407_p13 = pneg %p3406_p12 }
  0x32   : > { %3071 = vmatpush3.bf16.msra.mxu1 %v3279_v15  ;;  %v3300_v15 = vld [vmem:[%s4500_s9 + $0x48] ss:$12 sps:$4 sm:$0xff]  }
  0x33   : > { %3072 = vmatprep.subr.bf16.mxu1 %v3466_v1 }
  0x34   : > { %3053 = vmatpush3.bf16.msra.mxu0 %v3272_v5  ;;  %v3290_v5 = vld [vmem:[%s4500_s9 + $0x94] ss:$12 sps:$4 sm:$0xff]  }
  0x35   : > { %3054 = vmatprep.subr.bf16.mxu0 %v3466_v1 }
  0x36   : > { %3073 = vmatpush3.bf16.msra.mxu1 %v3280_v16  ;;  %v3303_v16 = vld [vmem:[%s4500_s9 + $0x50] ss:$12 sps:$4 sm:$0xff]  }
  0x37   : > { %3074 = vmatprep.subr.bf16.mxu1 %v3466_v1 }
  0x38   : > { %3055 = vmatpush3.bf16.msra.mxu0 %v3273_v6  ;;  %v3288_v6 = vld [vmem:[%s4500_s9 + $0x90] ss:$12 sps:$4 sm:$0xff]  }
  0x39   : > { %3056 = vmatprep.subr.bf16.mxu0 %v3466_v1 }
  0x3a   : > { %3075 = vmatpush3.bf16.msra.mxu1 %v3281_v17  ;;  %v3306_v17 = vld [vmem:[%s4500_s9 + $0x34] ss:$12 sps:$4 sm:$0xff]  }
  0x3b   : > { %3076 = vmatprep.subr.bf16.mxu1 %v3466_v1 }
  0x3c   : > { %3057 = vmatpush3.bf16.msra.mxu0 %v3274_v7  ;;  %v3291_v7 = vld [vmem:[%s4500_s9 + $0x98] ss:$12 sps:$4 sm:$0xff]  }
  0x3d   : > { %3058 = vmatprep.subr.bf16.mxu0 %v3466_v1 }
  0x3e   : > { %3077 = vmatpush3.bf16.msra.mxu1 %v3282_v18  ;;  %v3468_v18 = vmov 0  }
  0x3f   : > { %3078 = vmatprep.subr.bf16.mxu1 %v3466_v1 }
  0x40   : > { %3059 = vmatpush3.bf16.msra.mxu0 %v3275_v8  ;;  %v3294_v8 = vld [vmem:[%s4500_s9 + $0x7c] ss:$12 sps:$4 sm:$0xff]  }
  0x41   : > { %1176 = vmatprep.subr.bf16.mxu0 %v3286_v58  ;;  %v3871_v58 = vld [vmem:[%s4501_s10] sm:$0x7] }
  0x42   : > { %3079 = vmatpush3.bf16.msra.mxu1 %v3283_v19  ;;  %v3304_v19 = vld [vmem:[%s4500_s9 + $0x30] ss:$12 sps:$4 sm:$0xff]  }
  0x43   : > { %3061 = vmatmul.mubr.bf16.vlgmr.msra.gmra.mxu0 %v706_v11  ;;  %3084 = vmatprep.subr.bf16.mxu1 %v3466_v1  ;;  %v3296_v11 = vld [vmem:[%s4500_s9 + $0x60] ss:$12 sps:$4 sm:$0xff]  }
  0x44   : > { %1177 = vmatpush1.bf16.msra.mxu0 %v3284_v57  ;;  %1208 = vmatprep.mubr.bf16.mxu0 %v3468_v18 }
  0x45   : > { %1178 = vmatprep.subr.bf16.mxu0 %v3290_v5 }
  0x48   : > { %1179 = vmatpush1.bf16.msra.mxu0 %v3288_v6 }
  0x49   : > { %1180 = vmatprep.subr.bf16.mxu0 %v3294_v8 }
  0x4c   : > { %1181 = vmatpush1.bf16.msra.mxu0 %v3292_v9 }
  0x4d   : > { %1182 = vmatprep.subr.bf16.mxu0 %v3298_v12 }
  0x50   : > { %1183 = vmatpush1.bf16.msra.mxu0 %v3296_v11 }
  0x51   : > { %1184 = vmatprep.subr.bf16.mxu0 %v3302_v14 }
  0x54   : > { %1185 = vmatpush1.bf16.msra.mxu0 %v3300_v15 }
  0x55   : > { %1186 = vmatprep.subr.bf16.mxu0 %v3306_v17 }
  0x58   : > { %1187 = vmatpush1.bf16.msra.mxu0 %v3304_v19 }
 0x103   : > { %v812_v21 = vpop.f32.mrf.mxu0 }
 0x104   : > { %v813_v22 = vadd.f32 %v2786_v20, %v812_v21  ;;  %v3310_v21 = vld [vmem:[%s4500_s9 + $0x1c] ss:$12 sps:$4 sm:$0xff]  }
 0x105   : > { %v3062_v23 = vpop.f32.mrf.mxu0  ;;  %1188 = vmatprep.subr.bf16.mxu0 %v3310_v21 }
 0x106   : > { %v819_v24 = vmul.f32 %v813_v22, %v813_v22  ;;  %v3311_v23 = vld [vmem:[%s4500_s9 + $0x20] ss:$12 sps:$4 sm:$0xff]  }
 0x107   : > { %v815_v25 = vpop.f32.mrf.mxu0 }
 0x108   : > { %v821_v26 = vmul.f32 %v819_v24, %v813_v22  ;;  %v816_v27 = vadd.f32 %v2786_v20, %v815_v25  ;;  %v3307_v20 = vld [vmem:[%s4500_s9 + $0x38] ss:$12 sps:$4 sm:$0xff]   ;;  %v3312_v25 = vld [vmem:[%s4500_s9] ss:$12 sps:$4 sm:$0xff]  }
 0x109   : > { %v3063_v28 = vpop.f32.mrf.mxu0  ;;  %v3314_v24 = vld [vmem:[%s4500_s9 + $0x4] ss:$12 sps:$4 sm:$0xff]  }
 0x10a   : > { %v823_v29 = vmul.f32 0.044715, %v821_v26  ;;  %v820_v30 = vmul.f32 %v816_v27, %v816_v27  ;;  %v3315_v26 = vld [vmem:[%s4500_s9 + $0x8] ss:$12 sps:$4 sm:$0xff]  }
 0x10c   : > { %v825_v31 = vadd.f32 %v823_v29, %v813_v22  ;;  %v822_v32 = vmul.f32 %v820_v30, %v816_v27 }
 0x10e   : > { %v827_v33 = vmul.f32 0.7978846, %v825_v31  ;;  %v824_v34 = vmul.f32 0.044715, %v822_v32 }
 0x110   : > { %3388 = vtanh.f32 %v827_v33  ;;  %v826_v35 = vadd.f32 %v824_v34, %v816_v27 }
 0x112   : > { %v828_v36 = vmul.f32 0.7978846, %v826_v35  ;;  %v2804_v35 = vld [vmem:[%s4553_s7] ss:$0 sm:$0xff] }
 0x114   : > { %3390 = vtanh.f32 %v828_v36 }
 0x11d   : > { %v3389_v37 = vpop.eup %3388 }
 0x11e   : > { %v831_v38 = vadd.f32 1.0, %v3389_v37 }
 0x120   : > { %v833_v41 = vmul.f32 0.5, %v831_v38 }
 0x121   : > { %v3391_v39 = vpop.eup %3390 }
 0x122   : > { %v832_v40 = vadd.f32 1.0, %v3391_v39  ;;  %v835_v43 = vmul.f32 %v833_v41, %v813_v22  ;;  %v3308_v22 = vld [vmem:[%s4500_s9 + $0x18] ss:$12 sps:$4 sm:$0xff]   ;;  %v2805_v39 = vld [vmem:[%s4554_s8] ss:$0 sm:$0xff] }
 0x123   : > { %1189 = vmatpush1.bf16.msra.mxu0 %v3308_v22 }
 0x124   : > { %v834_v42 = vmul.f32 0.5, %v832_v40  ;;  %1190 = vmatprep.subr.bf16.mxu0 %v3314_v24 }
 0x126   : > { %v836_v44 = vmul.f32 %v834_v42, %v816_v27 }
 0x127   : > { %1191 = vmatpush1.bf16.msra.mxu0 %v3312_v25 }
 0x128   : > { %v837_v45 = vpack.c.bf16 %v836_v44, %v835_v43  ;;  %3104 = vmatprep.subr.bf16.mxu0 %v3466_v1  ;;  %v3316_v44 = vld [vmem:[%s4503_s12 + $0x38] sm:$0xff]  }
 0x12a   : > { %3081 = vmatmul.mubr.bf16.vlgmr.msra.gmra.mxu1 %v837_v45  ;;  %v3317_v45 = vld [vmem:[%s4503_s12 + $0x30] sm:$0xff]  }
 0x12b   : > { %3100 = vmatprep.mubr.msk.bf16.mxu1 %vm3467_vm0, %v3466_v1  ;;  %3085 = vmatpush3.bf16.msra.mxu1 %v3287_v59 }
 0x12c   : > { %3086 = vmatprep.subr.bf16.mxu1 %v3466_v1 }
 0x12f   : > { %3087 = vmatpush3.bf16.msra.mxu1 %v3291_v7 }
 0x130   : > { %3088 = vmatprep.subr.bf16.mxu1 %v3466_v1 }
 0x133   : > { %3089 = vmatpush3.bf16.msra.mxu1 %v3295_v10 }
 0x134   : > { %3090 = vmatprep.subr.bf16.mxu1 %v3466_v1 }
 0x137   : > { %3091 = vmatpush3.bf16.msra.mxu1 %v3299_v13 }
 0x138   : > { %3092 = vmatprep.subr.bf16.mxu1 %v3466_v1 }
 0x13b   : > { %3093 = vmatpush3.bf16.msra.mxu1 %v3303_v16 }
 0x13c   : > { %3094 = vmatprep.subr.bf16.mxu1 %v3466_v1 }
 0x13f   : > { %3095 = vmatpush3.bf16.msra.mxu1 %v3307_v20 }
 0x140   : > { %3096 = vmatprep.subr.bf16.mxu1 %v3466_v1 }
 0x143   : > { %3097 = vmatpush3.bf16.msra.mxu1 %v3311_v23 }
 0x144   : > { %3098 = vmatprep.subr.bf16.mxu1 %v3466_v1 }
 0x147   : > { %3099 = vmatpush3.bf16.msra.mxu1 %v3315_v26 }
 0x1ea   : > { %v943_v47 = vpop.f32.mrf.mxu1 }
 0x1eb   : > { %v944_v49 = vadd.f32 %v2795_v46, %v943_v47  ;;  %v3319_v47 = vld [vmem:[%s4503_s12 + $0x20] sm:$0xff]  }
 0x1ec   : > { %v3082_v50 = vpop.f32.mrf.mxu1 }
 0x1ed   : > { %v3722_v51 = vadd.f32 %v950_v48, %v944_v49  ;;  %v3320_v48 = vld [vmem:[%s4503_s12 + $0x18] sm:$0xff]   ;;  %v3321_v49 = vld [vmem:[%s4503_s12 + $0x10] sm:$0xff]   ;;  %v3322_v50 = vld [vmem:[%s4503_s12 + $0x8] sm:$0xff]  }
 0x1ee   : > { %v946_v52 = vpop.f32.mrf.mxu1 }
 0x1ef   : > { %v947_v54 = vadd.f32 %v2795_v46, %v946_v52  ;;  %957 = vadd.xlane.f32.xlu0 %v3722_v51  ;;  %v3318_v46 = vld [vmem:[%s4503_s12 + $0x28] sm:$0xff]   ;;  %v3323_v52 = vld [vmem:[%s4503_s12] sm:$0xff]  }
 0x1f0   : > { %v3083_v55 = vpop.f32.mrf.mxu1 }
 0x1f1   : > { %v3725_v56 = vadd.f32 %v951_v53, %v947_v54  ;;  %v954_v53 = vlaneseq }
 0x1f3   : > { %959 = vadd.xlane.f32.xlu0 %v3725_v56  ;;  %v3860_v54 = vshrl.u32 %v954_v53, 7 }
 0x1f5   : > { %v3863_v55 = vsub.s32 0, %v3860_v54  ;;  %v3866_v57 = vsub.s32 2, %v3860_v54  ;;  %v3888_v6 = vadd.s32 8, %v3860_v54  ;;  %vm1272_vm1 = vcmp.lt.s32.totalorder %v3860_v54, 1 }
 0x1f6   : > { %vm1275_vm2 = vcmp.ge.s32.totalorder %v3860_v54, 1  ;;  %v3896_v10 = vsub.s32 4, %v3860_v54  ;;  %v3899_v11 = vsub.s32 5, %v3860_v54  ;;  %vm1293_vm3 = vcmp.lt.s32.totalorder %v3860_v54, 2 }
 0x1f7   : > { %v1036_v59 = vrot.slane %v3871_v58, %v3863_v55  ;;  %v3904_v13 = vsub.s32 6, %v3860_v54  ;;  %v3907_v14 = vsub.s32 7, %v3860_v54  ;;  %vm1296_vm4 = vcmp.ge.s32.totalorder %v3860_v54, 2 }
 0x1f8   : > { %vm1314_vm5 = vcmp.lt.s32.totalorder %v3860_v54, 3  ;;  %vm1317_vm6 = vcmp.ge.s32.totalorder %v3860_v54, 3  ;;  %vm1335_vm7 = vcmp.lt.s32.totalorder %v3860_v54, 4  ;;  %vm1338_vm8 = vcmp.ge.s32.totalorder %v3860_v54, 4 }
 0x1f9   : > { %vm1356_vm9 = vcmp.lt.s32.totalorder %v3860_v54, 5  ;;  %vm1359_vm10 = vcmp.ge.s32.totalorder %v3860_v54, 5  ;;  %vm1377_vm11 = vcmp.lt.s32.totalorder %v3860_v54, 6  ;;  %vm4524_vm12 = vcmp.ge.s32.totalorder %v3860_v54, 6 }
 0x1fa   : > { %vm4521_vm13 = vcmp.lt.s32.totalorder %v3860_v54, 7  ;;  %vm4522_vm14 = vcmp.ge.s32.totalorder %v3860_v54, 7  ;;  %vm4523_vm15 = vcmp.ge.s32.totalorder %v3888_v6, 9 }
 0x278   : > { %v958_v60 = vpop.xlane.xlu0 %957 }
 0x279   : > { %v962_v61 = vmul.f32 0.0078125, %v958_v60  ;;  %v1044_v60 = vrot.slane %v3871_v58, %v3866_v57 }
 0x27b   : > { %v3739_v62 = vsub.f32 %v3722_v51, %v962_v61  ;;  %v1262_v61 = vld [vmem:[%s4502_s11] sm:$0xff] }
 0x27c   : > { %v960_v63 = vpop.xlane.xlu0 %959  ;;  %v1307_v12 = vrot.slane %v1262_v61, %v3866_v57  ;;  %v1349_v21 = vrot.slane %v1262_v61, %v3896_v10  ;;  %v3920_v22 = vrot.slane %v1262_v61, %v3899_v11  ;;  %v3927_v25 = vrot.slane %v1262_v61, %v3904_v13 }
 0x27d   : > { %v963_v0 = vmul.f32 0.0078125, %v960_v63  ;;  %v966_v2 = vmul.f32 %v3739_v62, %v3739_v62  ;;  %v3930_v26 = vrot.slane %v1262_v61, %v3907_v14 }
 0x27f   : > { %v3744_v3 = vsub.f32 %v3725_v56, %v963_v0  ;;  %968 = vadd.xlane.f32.xlu1 %v966_v2  ;;  %v3881_v0 = vsub.s32 1, %v3860_v54  ;;  %v1267_v2 = vrot.slane %v1262_v61, %v3863_v55 }
 0x281   : > { %v967_v4 = vmul.f32 %v3744_v3, %v3744_v3  ;;  %v1286_v9 = vrot.slane %v1262_v61, %v3881_v0 }
 0x283   : > { %970 = vadd.xlane.f32.xlu1 %v967_v4 }
 0x308   : > { %v969_v27 = vpop.xlane.xlu1 %968 }
 0x309   : > { %v972_v28 = vmul.f32 0.0078125, %v969_v27 }
 0x30b   : > { %v974_v29 = vadd.f32 1e-05, %v972_v28 }
 0x30c   : > { %v971_v30 = vpop.xlane.xlu1 %970 }
 0x30d   : > { %3392 = vrsqrt.f32 %v974_v29  ;;  %v973_v31 = vmul.f32 0.0078125, %v971_v30 }
 0x30f   : > { %v975_v32 = vadd.f32 1e-05, %v973_v31 }
 0x311   : > { %3394 = vrsqrt.f32 %v975_v32 }
 0x31a   : > { %v3393_v33 = vpop.eup %3392 }
 0x31b   : > { %v978_v34 = vmul.f32 %v3393_v33, %v3739_v62 }
 0x31d   : > { %v987_v38 = vmul.f32 %v2804_v35, %v978_v34 }
 0x31e   : > { %v3395_v36 = vpop.eup %3394 }
 0x31f   : > { %v979_v37 = vmul.f32 %v3395_v36, %v3744_v3  ;;  %v996_v41 = vadd.f32 %v2805_v39, %v987_v38  ;;  %v3885_v3 = vsub.s32 3, %v3860_v54 }
 0x321   : > { %v988_v40 = vmul.f32 %v2804_v35, %v979_v37 }
 0x323   : > { %v997_v42 = vadd.f32 %v2805_v39, %v988_v40 }
 0x325   : > { %v998_v43 = vpack.c.bf16 %v997_v42, %v996_v41 }
 0x327   : > { %1209 = vmatmul.mubr.bf16.vlgmr.msra.gmra.mxu0 %v998_v43  ;;  %3101 = vmatmul.mubr.bf16.vlgmr.msra.gmra.mxu1 %v998_v43 }
 0x328   : > { %3120 = vmatprep.mubr.msk.bf16.mxu0 %vm3467_vm0, %v3466_v1  ;;  %1916 = vmatprep.mubr.bf16.mxu1 %v3468_v18  ;;  %v1328_v18 = vrot.slane %v1262_v61, %v3885_v3 }
 0x329   : > { %3105 = vmatpush3.bf16.msra.mxu0 %v3316_v44 }
 0x32a   : > { %3106 = vmatprep.subr.bf16.mxu0 %v3466_v1 }
 0x32d   : > { %3107 = vmatpush3.bf16.msra.mxu0 %v3317_v45 }
 0x32e   : > { %3108 = vmatprep.subr.bf16.mxu0 %v3466_v1 }
 0x331   : > { %3109 = vmatpush3.bf16.msra.mxu0 %v3318_v46 }
 0x332   : > { %3110 = vmatprep.subr.bf16.mxu0 %v3466_v1 }
 0x335   : > { %3111 = vmatpush3.bf16.msra.mxu0 %v3319_v47 }
 0x336   : > { %3112 = vmatprep.subr.bf16.mxu0 %v3466_v1 }
 0x339   : > { %3113 = vmatpush3.bf16.msra.mxu0 %v3320_v48 }
 0x33a   : > { %3114 = vmatprep.subr.bf16.mxu0 %v3466_v1 }
 0x33d   : > { %3115 = vmatpush3.bf16.msra.mxu0 %v3321_v49 }
 0x33e   : > { %3116 = vmatprep.subr.bf16.mxu0 %v3466_v1 }
 0x341   : > { %3117 = vmatpush3.bf16.msra.mxu0 %v3322_v50 }
 0x342   : > { %3118 = vmatprep.subr.bf16.mxu0 %v3466_v1 }
 0x345   : > { %3119 = vmatpush3.bf16.msra.mxu0 %v3323_v52 }
 0x346   : > { %3124 = vmatprep.subr.bf16.mxu0 %v3466_v1 }
 0x3e7   : > { %v1210_v62 = vpop.f32.mrf.mxu0  ;;  %v1253_v63 = vpop.f32.mrf.mxu1 }
 0x3e8   : > { %v1211_v4 = vadd.f32 %v1210_v62, %v1036_v59  ;;  %v1254_v5 = vadd.f32 %v1253_v63, %v1044_v60 }
 0x3e9   : > { %v3891_v7 = vpop.f32.mrf.mxu0  ;;  %v3102_v8 = vpop.f32.mrf.mxu1 }
 0x3ea   : > { %v3909_v15 = vmul.f32 %v1254_v5, %v1211_v4 }
 0x3eb   : > { %v1214_v16 = vpop.f32.mrf.mxu0  ;;  %v1256_v17 = vpop.f32.mrf.mxu1 }
 0x3ec   : > { %v1215_v19 = vadd.f32 %v1214_v16, %v1036_v59  ;;  %v1257_v20 = vadd.f32 %v1256_v17, %v1044_v60  ;;  %v1268_v27 = vmul.f32 %v1267_v2, %v3909_v15  ;;  %v1270_v28 = vrot.slane %v3909_v15, 7 }
 0x3ed   : > { %v3103_v23 = vpop.f32.mrf.mxu1  ;;  %v1291_v29 = vrot.slane %v3909_v15, 6  ;;  %v1312_v30 = vrot.slane %v3909_v15, 5  ;;  %v1333_v34 = vrot.slane %v3909_v15, 4  ;;  %v1354_v37 = vrot.slane %v3909_v15, 3 }
 0x3ee   : > { %v3922_v24 = vmul.f32 %v1257_v20, %v1215_v19  ;;  %v1375_v38 = vrot.slane %v3909_v15, 2  ;;  %v1396_v19 = vrot.slane %v3909_v15, 1  ;;  %v3983_v20 = vld [vmem:[%s4502_s11 + $0x8] sm:$0xff] }
 0x3f0   : > { %v1271_v31 = vrot.slane %v3922_v24, 7  ;;  %v1292_v32 = vrot.slane %v3922_v24, 6  ;;  %v1313_v33 = vrot.slane %v3922_v24, 5  ;;  %v1269_v35 = vmul.f32 %v1267_v2, %v3922_v24 }
 0x3f1   : > { %v1334_v36 = vrot.slane %v3922_v24, 4  ;;  %v1355_v46 = vrot.slane %v3922_v24, 3  ;;  %v1376_v50 = vrot.slane %v3922_v24, 2  ;;  %v1397_v60 = vrot.slane %v3922_v24, 1 }
 0x3f2   : > { %v1273_v39 = vsel %vm1272_vm1, %v1270_v28, %v1271_v31  ;;  %v1274_v40 = vsel %vm1272_vm1, %v1271_v31, %v1270_v28  ;;  %v1294_v41 = vsel %vm1293_vm3, %v1291_v29, %v1292_v32  ;;  %v1295_v42 = vsel %vm1293_vm3, %v1292_v32, %v1291_v29 }
 0x3f3   : > { %v1281_v43 = vsel %vm1275_vm2, %v1274_v40, 0.0  ;;  %v1288_v44 = vmul.f32 %v1286_v9, %v1273_v39  ;;  %v1302_v45 = vsel %vm1296_vm4, %v1295_v42, 0.0  ;;  %v1315_v48 = vsel %vm1314_vm5, %v1312_v30, %v1313_v33 }
 0x3f4   : > { %v1287_v47 = vmul.f32 %v1286_v9, %v1281_v43  ;;  %v1316_v49 = vsel %vm1314_vm5, %v1313_v33, %v1312_v30  ;;  %v1309_v53 = vmul.f32 %v1307_v12, %v1294_v41  ;;  %v1308_v62 = vmul.f32 %v1307_v12, %v1302_v45 }
 0x3f5   : > { %v1290_v52 = vadd.f32 %v1288_v44, %v1269_v35  ;;  %v1323_v59 = vsel %vm1317_vm6, %v1316_v49, 0.0  ;;  %v1336_v63 = vsel %vm1335_vm7, %v1333_v34, %v1334_v36  ;;  %v1337_v2 = vsel %vm1335_vm7, %v1334_v36, %v1333_v34 }
 0x3f6   : > { %v1289_v61 = vadd.f32 %v1287_v47, %v1268_v27  ;;  %v1330_v5 = vmul.f32 %v1328_v18, %v1315_v48  ;;  %v1344_v8 = vsel %vm1338_vm8, %v1337_v2, 0.0  ;;  %v3975_v9 = vsel %vm1356_vm9, %v1355_v46, %v1354_v37 }
 0x3f7   : > { %v1311_v4 = vadd.f32 %v1309_v53, %v1290_v52  ;;  %v1329_v17 = vmul.f32 %v1328_v18, %v1323_v59  ;;  %v1357_v12 = vsel %vm1356_vm9, %v1354_v37, %v1355_v46  ;;  %v1351_v24 = vmul.f32 %v1349_v21, %v1336_v63 }
 0x3f8   : > { %v1310_v16 = vadd.f32 %v1308_v62, %v1289_v61  ;;  %v1365_v27 = vsel %vm1359_vm10, %v3975_v9, 0.0  ;;  %v1379_v28 = vsel %vm1377_vm11, %v1376_v50, %v1375_v38  ;;  %v1350_v29 = vmul.f32 %v1349_v21, %v1344_v8 }
 0x3f9   : > { %v1332_v23 = vadd.f32 %v1330_v5, %v1311_v4  ;;  %v1378_v30 = vsel %vm1377_vm11, %v1375_v38, %v1376_v50  ;;  %v1372_v32 = vmul.f32 %v3920_v22, %v1357_v12  ;;  %v1386_v33 = vsel %vm4524_vm12, %v1379_v28, 0.0 }
 0x3fa   : > { %v1331_v18 = vadd.f32 %v1329_v17, %v1310_v16  ;;  %v1400_v34 = vsel %vm4521_vm13, %v1397_v60, %v1396_v19  ;;  %v1371_v36 = vmul.f32 %v3920_v22, %v1365_v27  ;;  %v1399_v21 = vsel %vm4521_vm13, %v1396_v19, %v1397_v60 }
 0x3fb   : > { %v1353_v31 = vadd.f32 %v1351_v24, %v1332_v23  ;;  %v1428_v37 = vrot.slane %v3983_v20, %v3863_v55  ;;  %v1393_v39 = vmul.f32 %v3927_v25, %v1378_v30  ;;  %v1407_v41 = vsel %vm4522_vm14, %v1400_v34, 0.0 }
 0x3fc   : > { %v1352_v35 = vadd.f32 %v1350_v29, %v1331_v18  ;;  %v1392_v44 = vmul.f32 %v3927_v25, %v1386_v33  ;;  %v1414_v22 = vmul.f32 %v3930_v26, %v1399_v21  ;;  %v1444_v46 = vrot.slane %v3983_v20, %v3881_v0 }
 0x3fd   : > { %v1374_v38 = vadd.f32 %v1372_v32, %v1353_v31  ;;  %vm4525_vm13 = vcmp.ge.s32.totalorder %v3888_v6, 10  ;;  %v1413_v48 = vmul.f32 %v3930_v26, %v1407_v41  ;;  %v1429_v50 = vmul.f32 0.0, %v1428_v37 }
 0x3fe   : > { %v1373_v43 = vadd.f32 %v1371_v36, %v1352_v35  ;;  %v1440_v52 = vsel %vm4523_vm15, %v1274_v40, 0.0  ;;  %v1430_v59 = vmul.f32 %v1428_v37, %v3909_v15  ;;  %v1460_v25 = vrot.slane %v3983_v20, %v3866_v57 }
 0x3ff   : > { %v1395_v45 = vadd.f32 %v1393_v39, %v1374_v38  ;;  %vm1466_vm14 = vcmp.ge.s32.totalorder %v3888_v6, 11  ;;  %v1445_v61 = vmul.f32 0.0, %v1444_v46  ;;  %v1456_v62 = vsel %vm4525_vm13, %v1295_v42, 0.0 }
 0x400   : > { %v1394_v47 = vadd.f32 %v1392_v44, %v1373_v43  ;;  %v1446_v4 = vmul.f32 %v1444_v46, %v1440_v52  ;;  %v1476_v26 = vrot.slane %v3983_v20, %v3885_v3  ;;  %vm4526_vm15 = vcmp.ge.s32.totalorder %v3888_v6, 12 }
 0x401   : > { %v1416_v53 = vadd.f32 %v1414_v22, %v1395_v45  ;;  %v1461_v5 = vmul.f32 0.0, %v1460_v25  ;;  %v1472_v15 = vsel %vm1466_vm14, %v1316_v49, 0.0  ;;  %v1462_v16 = vmul.f32 %v1460_v25, %v1456_v62  ;;  %v1216_v45 = vpop.f32.mrf.mxu0 }
 0x402   : > { %v1415_v60 = vadd.f32 %v1413_v48, %v1394_v47  ;;  %v1492_v17 = vrot.slane %v3983_v20, %v3896_v10  ;;  %vm1498_vm12 = vcmp.ge.s32.totalorder %v3888_v6, 13  ;;  %v1477_v12 = vmul.f32 0.0, %v1476_v26 }
 0x403   : > { %v1432_v63 = vadd.f32 %v1430_v59, %v1416_v53  ;;  %v1488_v19 = vsel %vm4526_vm15, %v1337_v2, 0.0  ;;  %v1478_v24 = vmul.f32 %v1476_v26, %v1472_v15  ;;  %v1508_v27 = vrot.slane %v3983_v20, %v3899_v11  ;;  %v3326_v15 = vld [vmem:[%s4500_s9 + $0x16c] ss:$12 sps:$4 sm:$0xff]  }
 0x404   : > { %v1431_v40 = vadd.f32 %v1429_v50, %v1415_v60  ;;  %vm1514_vm13 = vcmp.ge.s32.totalorder %v3888_v6, 14  ;;  %v1493_v18 = vmul.f32 0.0, %v1492_v17  ;;  %v1504_v29 = vsel %vm1498_vm12, %v3975_v9, 0.0  ;;  %1884 = vmatprep.subr.bf16.mxu1 %v3326_v15  ;;  %v3359_v15 = vld [vmem:[%s4503_s12 + $0x60] sm:$0xff]  }
 0x405   : > { %v1448_v8 = vadd.f32 %v1446_v4, %v1432_v63  ;;  %v1494_v31 = vmul.f32 %v1492_v17, %v1488_v19  ;;  %v1524_v32 = vrot.slane %v3983_v20, %v3904_v13  ;;  %vm1530_vm15 = vcmp.ge.s32.totalorder %v3888_v6, 15 }
 0x406   : > { %v1447_v42 = vadd.f32 %v1445_v61, %v1431_v40  ;;  %v1509_v33 = vmul.f32 0.0, %v1508_v27  ;;  %v1520_v35 = vsel %vm1514_vm13, %v1379_v28, 0.0  ;;  %v1510_v21 = vmul.f32 %v1508_v27, %v1504_v29  ;;  %v3330_v27 = vld [vmem:[%s4500_s9 + $0x154] ss:$12 sps:$4 sm:$0xff]   ;;  %v3334_v29 = vld [vmem:[%s4500_s9 + $0x13c] ss:$12 sps:$4 sm:$0xff]  }
 0x407   : > { %v1464_v23 = vadd.f32 %v1462_v16, %v1448_v8  ;;  %v1540_v37 = vrot.slane %v3983_v20, %v3907_v14  ;;  %v1525_v39 = vmul.f32 0.0, %v1524_v32  ;;  %v1536_v9 = vsel %vm1530_vm15, %v1400_v34, 0.0 }
 0x408   : > { %v1463_v49 = vadd.f32 %v1461_v5, %v1447_v42  ;;  %v1526_v43 = vmul.f32 %v1524_v32, %v1520_v35  ;;  %v1040_v44 = vrot.slane %v3871_v58, %v3881_v0  ;;  %v2830_v58 = vld [vmem:[%s4504_s13] ss:$0 sm:$0xff]  ;;  %v3324_v5 = vld [vmem:[%s4500_s9 + $0x168] ss:$12 sps:$4 sm:$0xff]   ;;  %v3343_v35 = vld [vmem:[%s4500_s9 + $0x110] ss:$12 sps:$4 sm:$0xff]  }
 0x409   : > { %v1480_v30 = vadd.f32 %v1478_v24, %v1464_v23  ;;  %v1541_v46 = vmul.f32 0.0, %v1540_v37  ;;  %v1542_v28 = vmul.f32 %v1540_v37, %v1536_v9  ;;  %1885 = vmatpush1.bf16.msra.mxu1 %v3324_v5  ;;  %v3328_v24 = vld [vmem:[%s4500_s9 + $0x150] ss:$12 sps:$4 sm:$0xff]   ;;  %v3339_v32 = vld [vmem:[%s4500_s9 + $0x128] ss:$12 sps:$4 sm:$0xff]  }
 0x40a   : > { %v1479_v2 = vadd.f32 %v1477_v12, %v1463_v49  ;;  %v1217_v50 = vadd.f32 %v1216_v45, %v1040_v44  ;;  %v1213_v20 = vadd.f32 %v3891_v7, %v1040_v44  ;;  %v3331_v49 = vld [vmem:[%s4500_s9 + $0x158] ss:$12 sps:$4 sm:$0xff]   ;;  %1886 = vmatprep.subr.bf16.mxu1 %v3330_v27  ;;  %v3351_v9 = vld [vmem:[%s4500_s9 + $0xe0] ss:$12 sps:$4 sm:$0xff]   ;;  %v3355_v44 = vld [vmem:[%s4500_s9 + $0xc8] ss:$12 sps:$4 sm:$0xff]  }
 0x40b   : > { %v1496_v36 = vadd.f32 %v1494_v31, %v1480_v30  ;;  %v3335_v30 = vld [vmem:[%s4500_s9 + $0x140] ss:$12 sps:$4 sm:$0xff]   ;;  %v3338_v31 = vld [vmem:[%s4500_s9 + $0x124] ss:$12 sps:$4 sm:$0xff]  }
 0x40c   : > { %v1495_v38 = vadd.f32 %v1493_v18, %v1479_v2  ;;  %v3332_v18 = vld [vmem:[%s4500_s9 + $0x138] ss:$12 sps:$4 sm:$0xff]   ;;  %v3336_v2 = vld [vmem:[%s4500_s9 + $0x120] ss:$12 sps:$4 sm:$0xff]  }
 0x40d   : > { %v1512_v41 = vadd.f32 %v1510_v21, %v1496_v36  ;;  %1887 = vmatpush1.bf16.msra.mxu1 %v3328_v24  ;;  %v3340_v36 = vld [vmem:[%s4500_s9 + $0x108] ss:$12 sps:$4 sm:$0xff]   ;;  %v3347_v37 = vld [vmem:[%s4500_s9 + $0xf8] ss:$12 sps:$4 sm:$0xff]   ;;  %v3352_v45 = vld [vmem:[%s4500_s9 + $0xc0] ss:$12 sps:$4 sm:$0xff]  }
 0x40e   : > { %v1511_v22 = vadd.f32 %v1509_v33, %v1495_v38  ;;  %1888 = vmatprep.subr.bf16.mxu1 %v3334_v29  ;;  %v3342_v33 = vld [vmem:[%s4500_s9 + $0x10c] ss:$12 sps:$4 sm:$0xff]   ;;  %v3346_v21 = vld [vmem:[%s4500_s9 + $0xf4] ss:$12 sps:$4 sm:$0xff]   ;;  %v3344_v38 = vld [vmem:[%s4500_s9 + $0xf0] ss:$12 sps:$4 sm:$0xff]  }
 0x40f   : > { %v1528_v47 = vadd.f32 %v1526_v43, %v1512_v41  ;;  %v3348_v41 = vld [vmem:[%s4500_s9 + $0xd8] ss:$12 sps:$4 sm:$0xff]   ;;  %v3358_v5 = vld [vmem:[%s4503_s12 + $0x68] sm:$0xff]  }
 0x410   : > { %v1527_v48 = vadd.f32 %v1525_v39, %v1511_v22  ;;  %v3350_v39 = vld [vmem:[%s4500_s9 + $0xdc] ss:$12 sps:$4 sm:$0xff]   ;;  %v3354_v43 = vld [vmem:[%s4500_s9 + $0xc4] ss:$12 sps:$4 sm:$0xff]  }
 0x411   : > { %v1544_v52 = vadd.f32 %v1542_v28, %v1528_v47  ;;  %1889 = vmatpush1.bf16.msra.mxu1 %v3332_v18  ;;  %v4213_v18 = vld [vmem:[%s4502_s11 + $0x10] sm:$0xff] }
 0x412   : > { %v1543_v53 = vadd.f32 %v1541_v46, %v1527_v48  ;;  %1890 = vmatprep.subr.bf16.mxu1 %v3338_v31 }
 0x413   : > { %v1546_v59 = vmul.f32 %v1544_v52, %v1217_v50 }
 0x414   : > { %v1545_v25 = vmul.f32 %v1543_v53, %v1213_v20  ;;  %v2840_v53 = vld [vmem:[%s4553_s7 + $0x1] ss:$0 sm:$0xff] }
 0x415   : > { %1891 = vmatpush1.bf16.msra.mxu1 %v3336_v2 }
 0x416   : > { %v1547_v60 = vpack.c.bf16 %v1546_v59, %v1545_v25  ;;  %1892 = vmatprep.subr.bf16.mxu1 %v3342_v33  ;;  %v1976_v33 = vrot.slane %v4213_v18, %v3863_v55 }
 0x418   : > { %3121 = vmatmul.mubr.bf16.vlgmr.msra.gmra.mxu0 %v1547_v60 }
 0x419   : > { %3140 = vmatprep.mubr.msk.bf16.mxu0 %vm3467_vm0, %v3466_v1  ;;  %1893 = vmatpush1.bf16.msra.mxu1 %v3340_v36 }
 0x41a   : > { %1894 = vmatprep.subr.bf16.mxu1 %v3346_v21  ;;  %v1988_v21 = vrot.slane %v4213_v18, %v3881_v0 }
 0x41d   : > { %1895 = vmatpush1.bf16.msra.mxu1 %v3344_v38  ;;  %v2016_v38 = vrot.slane %v4213_v18, %v3885_v3 }
 0x41e   : > { %1896 = vmatprep.subr.bf16.mxu1 %v3350_v39 }
 0x421   : > { %1897 = vmatpush1.bf16.msra.mxu1 %v3348_v41  ;;  %v2030_v41 = vrot.slane %v4213_v18, %v3896_v10 }
 0x422   : > { %1898 = vmatprep.subr.bf16.mxu1 %v3354_v43  ;;  %v2044_v43 = vrot.slane %v4213_v18, %v3899_v11 }
 0x425   : > { %1899 = vmatpush1.bf16.msra.mxu1 %v3352_v45 }
 0x426   : > { %3144 = vmatprep.subr.bf16.mxu1 %v3466_v1 }
 0x4d8   : > { %v1653_v34 = vpop.f32.mrf.mxu0 }
 0x4d9   : > { %v1654_v61 = vadd.f32 %v2830_v58, %v1653_v34 }
 0x4da   : > { %v3122_v62 = vpop.f32.mrf.mxu0 }
 0x4db   : > { %v4055_v63 = vadd.f32 %v1654_v61, %v3722_v51  ;;  %v3327_v51 = vld [vmem:[%s4500_s9 + $0x170] ss:$12 sps:$4 sm:$0xff]  }
 0x4dc   : > { %v1656_v4 = vpop.f32.mrf.mxu0  ;;  %3125 = vmatpush3.bf16.msra.mxu0 %v3327_v51  ;;  %v3360_v51 = vld [vmem:[%s4503_s12 + $0x58] sm:$0xff]  }
 0x4dd   : > { %v1657_v7 = vadd.f32 %v2830_v58, %v1656_v4  ;;  %1662 = vadd.xlane.f32.xlu0 %v4055_v63  ;;  %3126 = vmatprep.subr.bf16.mxu0 %v3466_v1  ;;  %v2842_v58 = vld [vmem:[%s4554_s8 + $0x1] ss:$0 sm:$0xff] }
 0x4de   : > { %v3123_v26 = vpop.f32.mrf.mxu0 }
 0x4df   : > { %v4059_v40 = vadd.f32 %v1657_v7, %v3725_v56  ;;  %v3356_v7 = vld [vmem:[%s4503_s12 + $0x78] sm:$0xff]   ;;  %v3357_v26 = vld [vmem:[%s4503_s12 + $0x70] sm:$0xff]  }
 0x4e0   : > { %3127 = vmatpush3.bf16.msra.mxu0 %v3331_v49 }
 0x4e1   : > { %1664 = vadd.xlane.f32.xlu1 %v4059_v40  ;;  %3128 = vmatprep.subr.bf16.mxu0 %v3466_v1 }
 0x4e4   : > { %3129 = vmatpush3.bf16.msra.mxu0 %v3335_v30 }
 0x4e5   : > { %3130 = vmatprep.subr.bf16.mxu0 %v3466_v1 }
 0x4e8   : > { %3131 = vmatpush3.bf16.msra.mxu0 %v3339_v32 }
 0x4e9   : > { %3132 = vmatprep.subr.bf16.mxu0 %v3466_v1 }
 0x4ec   : > { %3133 = vmatpush3.bf16.msra.mxu0 %v3343_v35 }
 0x4ed   : > { %3134 = vmatprep.subr.bf16.mxu0 %v3466_v1 }
 0x4f0   : > { %3135 = vmatpush3.bf16.msra.mxu0 %v3347_v37  ;;  %v2002_v37 = vrot.slane %v4213_v18, %v3866_v57 }
 0x4f1   : > { %3136 = vmatprep.subr.bf16.mxu0 %v3466_v1 }
 0x4f4   : > { %3137 = vmatpush3.bf16.msra.mxu0 %v3351_v9 }
 0x4f5   : > { %3138 = vmatprep.subr.bf16.mxu0 %v3466_v1 }
 0x4f8   : > { %3139 = vmatpush3.bf16.msra.mxu0 %v3355_v44  ;;  %v2058_v44 = vrot.slane %v4213_v18, %v3904_v13 }
 0x4f9   : > { %3164 = vmatprep.subr.bf16.mxu0 %v3466_v1 }
 0x566   : > { %v1663_v56 = vpop.xlane.xlu0 %1662 }
 0x567   : > { %v1666_v8 = vmul.f32 0.0078125, %v1663_v56  ;;  %v3361_v56 = vld [vmem:[%s4503_s12 + $0x50] sm:$0xff]  }
 0x569   : > { %v4073_v16 = vsub.f32 %v4055_v63, %v1666_v8  ;;  %v3364_v8 = vld [vmem:[%s4505_s14 + $0x38] sm:$0xff]  }
 0x56a   : > { %v1665_v17 = vpop.xlane.xlu1 %1664 }
 0x56b   : > { %v1667_v42 = vmul.f32 0.0078125, %v1665_v17  ;;  %v1670_v12 = vmul.f32 %v4073_v16, %v4073_v16  ;;  %v3363_v17 = vld [vmem:[%s4503_s12 + $0x40] sm:$0xff]  }
 0x56d   : > { %v4078_v19 = vsub.f32 %v4059_v40, %v1667_v42  ;;  %1672 = vadd.xlane.f32.xlu0 %v1670_v12  ;;  %v4204_v42 = vld [vmem:[%s4501_s10 + $0x3] sm:$0x7] }
 0x56e   : > { %v1744_v12 = vrot.slane %v4204_v42, %v3863_v55 }
 0x56f   : > { %v1671_v23 = vmul.f32 %v4078_v19, %v4078_v19 }
 0x571   : > { %1674 = vadd.xlane.f32.xlu1 %v1671_v23 }
 0x5f6   : > { %v1673_v22 = vpop.xlane.xlu0 %1672 }
 0x5f7   : > { %v1676_v46 = vmul.f32 0.0078125, %v1673_v22 }
 0x5f9   : > { %v1678_v47 = vadd.f32 1e-05, %v1676_v46 }
 0x5fa   : > { %v1675_v28 = vpop.xlane.xlu1 %1674 }
 0x5fb   : > { %3396 = vrsqrt.f32 %v1678_v47  ;;  %v1677_v48 = vmul.f32 0.0078125, %v1675_v28 }
 0x5fd   : > { %v1679_v50 = vadd.f32 1e-05, %v1677_v48 }
 0x5ff   : > { %3398 = vrsqrt.f32 %v1679_v50 }
 0x608   : > { %v3397_v52 = vpop.eup %3396 }
 0x609   : > { %v1682_v20 = vmul.f32 %v3397_v52, %v4073_v16  ;;  %v3362_v16 = vld [vmem:[%s4503_s12 + $0x48] sm:$0xff]  }
 0x60b   : > { %v1692_v60 = vmul.f32 %v2840_v53, %v1682_v20 }
 0x60c   : > { %v3399_v59 = vpop.eup %3398 }
 0x60d   : > { %v1683_v25 = vmul.f32 %v3399_v59, %v4078_v19  ;;  %v1702_v61 = vadd.f32 %v2842_v58, %v1692_v60  ;;  %v1752_v19 = vrot.slane %v4204_v42, %v3866_v57 }
 0x60f   : > { %v1693_v34 = vmul.f32 %v2840_v53, %v1683_v25 }
 0x611   : > { %v1703_v62 = vadd.f32 %v2842_v58, %v1693_v34 }
 0x613   : > { %v1704_v4 = vpack.c.bf16 %v1703_v62, %v1702_v61 }
 0x615   : > { %1917 = vmatmul.mubr.bf16.vlgmr.msra.gmra.mxu1 %v1704_v4  ;;  %3141 = vmatmul.mubr.bf16.vlgmr.msra.gmra.mxu0 %v1704_v4 }
 0x616   : > { %3160 = vmatprep.mubr.msk.bf16.mxu1 %vm3467_vm0, %v3466_v1  ;;  %3180 = vmatprep.mubr.msk.bf16.mxu0 %vm3467_vm0, %v3466_v1 }
 0x617   : > { %3145 = vmatpush3.bf16.msra.mxu1 %v3356_v7  ;;  %3165 = vmatpush3.bf16.msra.mxu0 %v3364_v8 }
 0x618   : > { %3146 = vmatprep.subr.bf16.mxu1 %v3466_v1  ;;  %3166 = vmatprep.subr.bf16.mxu0 %v3466_v1 }
 0x61b   : > { %3147 = vmatpush3.bf16.msra.mxu1 %v3357_v26 }
 0x61c   : > { %3148 = vmatprep.subr.bf16.mxu1 %v3466_v1 }
 0x61f   : > { %3149 = vmatpush3.bf16.msra.mxu1 %v3358_v5 }
 0x620   : > { %3150 = vmatprep.subr.bf16.mxu1 %v3466_v1 }
 0x623   : > { %3151 = vmatpush3.bf16.msra.mxu1 %v3359_v15 }
 0x624   : > { %3152 = vmatprep.subr.bf16.mxu1 %v3466_v1 }
 0x627   : > { %3153 = vmatpush3.bf16.msra.mxu1 %v3360_v51 }
 0x628   : > { %3154 = vmatprep.subr.bf16.mxu1 %v3466_v1 }
 0x62b   : > { %3155 = vmatpush3.bf16.msra.mxu1 %v3361_v56 }
 0x62c   : > { %3156 = vmatprep.subr.bf16.mxu1 %v3466_v1 }
 0x62f   : > { %3157 = vmatpush3.bf16.msra.mxu1 %v3362_v16 }
 0x630   : > { %3158 = vmatprep.subr.bf16.mxu1 %v3466_v1 }
 0x633   : > { %3159 = vmatpush3.bf16.msra.mxu1 %v3363_v17 }
 0x634   : > { %3184 = vmatprep.subr.bf16.mxu1 %v3466_v1 }
 0x6d5   : > { %v1918_v23 = vpop.f32.mrf.mxu1  ;;  %v1961_v24 = vpop.f32.mrf.mxu0 }
 0x6d6   : > { %v1919_v27 = vadd.f32 %v1918_v23, %v1744_v12  ;;  %v1962_v49 = vadd.f32 %v1961_v24, %v1752_v19 }
 0x6d7   : > { %v4215_v29 = vpop.f32.mrf.mxu1  ;;  %v3142_v30 = vpop.f32.mrf.mxu0 }
 0x6d8   : > { %v4217_v31 = vmul.f32 %v1962_v49, %v1919_v27 }
 0x6d9   : > { %v1922_v32 = vpop.f32.mrf.mxu1  ;;  %v1964_v2 = vpop.f32.mrf.mxu0 }
 0x6da   : > { %v1923_v35 = vadd.f32 %v1922_v32, %v1744_v12  ;;  %v1965_v36 = vadd.f32 %v1964_v2, %v1752_v19  ;;  %v1977_v45 = vmul.f32 %v1976_v33, %v4217_v31  ;;  %v1979_v22 = vrot.slane %v4217_v31, 7 }
 0x6db   : > { %v3143_v39 = vpop.f32.mrf.mxu0  ;;  %v1993_v46 = vrot.slane %v4217_v31, 6  ;;  %v2007_v47 = vrot.slane %v4217_v31, 5  ;;  %v2021_v52 = vrot.slane %v4217_v31, 4  ;;  %v2035_v59 = vrot.slane %v4217_v31, 3 }
 0x6dc   : > { %v1969_v9 = vmul.f32 %v1965_v36, %v1923_v35  ;;  %v2049_v25 = vrot.slane %v4217_v31, 2 }
 0x6de   : > { %v1980_v28 = vrot.slane %v1969_v9, 7  ;;  %v1994_v48 = vrot.slane %v1969_v9, 6  ;;  %v2008_v50 = vrot.slane %v1969_v9, 5  ;;  %v1978_v20 = vmul.f32 %v1976_v33, %v1969_v9 }
 0x6df   : > { %v2022_v53 = vrot.slane %v1969_v9, 4  ;;  %v2036_v26 = vrot.slane %v1969_v9, 3  ;;  %v2050_v56 = vrot.slane %v1969_v9, 2  ;;  %v2064_v12 = vrot.slane %v1969_v9, 1 }
 0x6e0   : > { %v1981_v60 = vsel %vm1272_vm1, %v1979_v22, %v1980_v28  ;;  %v1982_v58 = vsel %vm1272_vm1, %v1980_v28, %v1979_v22  ;;  %v1995_v34 = vsel %vm1293_vm3, %v1993_v46, %v1994_v48  ;;  %v1996_v61 = vsel %vm1293_vm3, %v1994_v48, %v1993_v46  ;;  %v2901_v22 = vld [vmem:[%s4502_s11 + $0x18] sm:$0xff] }
 0x6e1   : > { %v1983_v62 = vsel %vm1275_vm2, %v1982_v58, 0.0  ;;  %v1990_v4 = vmul.f32 %v1988_v21, %v1981_v60  ;;  %v1997_v7 = vsel %vm1296_vm4, %v1996_v61, 0.0  ;;  %v2009_v15 = vsel %vm1314_vm5, %v2007_v47, %v2008_v50 }
 0x6e2   : > { %v1989_v5 = vmul.f32 %v1988_v21, %v1983_v62  ;;  %v2010_v51 = vsel %vm1314_vm5, %v2008_v50, %v2007_v47  ;;  %v2004_v16 = vmul.f32 %v2002_v37, %v1995_v34  ;;  %v2003_v23 = vmul.f32 %v2002_v37, %v1997_v7 }
 0x6e3   : > { %v1992_v8 = vadd.f32 %v1990_v4, %v1978_v20  ;;  %v2011_v17 = vsel %vm1317_vm6, %v2010_v51, 0.0  ;;  %v2023_v24 = vsel %vm1335_vm7, %v2021_v52, %v2022_v53  ;;  %v2024_v27 = vsel %vm1335_vm7, %v2022_v53, %v2021_v52 }
 0x6e4   : > { %v1991_v19 = vadd.f32 %v1989_v5, %v1977_v45  ;;  %v2018_v30 = vmul.f32 %v2016_v38, %v2009_v15  ;;  %v2025_v32 = vsel %vm1338_vm8, %v2024_v27, 0.0  ;;  %v2038_v2 = vsel %vm1356_vm9, %v2036_v26, %v2035_v59 }
 0x6e5   : > { %v2006_v49 = vadd.f32 %v2004_v16, %v1992_v8  ;;  %v2017_v35 = vmul.f32 %v2016_v38, %v2011_v17  ;;  %v2037_v36 = vsel %vm1356_vm9, %v2035_v59, %v2036_v26  ;;  %v2063_v21 = vrot.slane %v4217_v31, 1 }
 0x6e6   : > { %v2005_v33 = vadd.f32 %v2003_v23, %v1991_v19  ;;  %v2032_v39 = vmul.f32 %v2030_v41, %v2023_v24  ;;  %v2039_v9 = vsel %vm1359_vm10, %v2038_v2, 0.0  ;;  %v2052_v45 = vsel %vm1377_vm11, %v2050_v56, %v2049_v25 }
 0x6e7   : > { %v2020_v37 = vadd.f32 %v2018_v30, %v2006_v49  ;;  %v2031_v47 = vmul.f32 %v2030_v41, %v2025_v32  ;;  %v2051_v38 = vsel %vm1377_vm11, %v2049_v25, %v2050_v56  ;;  %v2072_v28 = vrot.slane %v4213_v18, %v3907_v14 }
 0x6e8   : > { %v2019_v46 = vadd.f32 %v2017_v35, %v2005_v33  ;;  %v2046_v50 = vmul.f32 %v2044_v43, %v2037_v36  ;;  %vm4555_vm1 = vcmp.ge.s32.totalorder %v3860_v54, 6  ;;  %vm4556_vm2 = vcmp.lt.s32.totalorder %v3860_v54, 7 }
 0x6e9   : > { %v2034_v48 = vadd.f32 %v2032_v39, %v2020_v37  ;;  %v2053_v52 = vsel %vm4555_vm1, %v2052_v45, 0.0  ;;  %v2066_v20 = vsel %vm4556_vm2, %v2064_v12, %v2063_v21  ;;  %v2045_v59 = vmul.f32 %v2044_v43, %v2039_v9  ;;  %vm4557_vm3 = vmmov %vm4556_vm2 }
 0x6ea   : > { %v2033_v53 = vadd.f32 %v2031_v47, %v2019_v46  ;;  %v2065_v60 = vsel %vm4557_vm3, %v2063_v21, %v2064_v12  ;;  %v2060_v34 = vmul.f32 %v2058_v44, %v2051_v38  ;;  %vm4558_vm4 = vcmp.ge.s32.totalorder %v3860_v54, 7 }
 0x6eb   : > { %v2048_v41 = vadd.f32 %v2046_v50, %v2034_v48  ;;  %v2067_v25 = vsel %vm4558_vm4, %v2066_v20, 0.0  ;;  %v2082_v18 = vrot.slane %v2901_v22, %v3863_v55  ;;  %v2059_v4 = vmul.f32 %v2058_v44, %v2053_v52 }
 0x6ec   : > { %v2047_v62 = vadd.f32 %v2045_v59, %v2033_v53  ;;  %v2074_v26 = vmul.f32 %v2072_v28, %v2065_v60  ;;  %v2092_v5 = vrot.slane %v2901_v22, %v3881_v0  ;;  %v2073_v56 = vmul.f32 %v2072_v28, %v2067_v25 }
 0x6ed   : > { %v2062_v7 = vadd.f32 %v2060_v34, %v2048_v41  ;;  %v2083_v8 = vmul.f32 0.0, %v2082_v18  ;;  %vm4559_vm5 = vcmp.ge.s32.totalorder %v3888_v6, 9  ;;  %v2084_v17 = vmul.f32 %v2082_v18, %v4217_v31 }
 0x6ee   : > { %v2061_v15 = vadd.f32 %v2059_v4, %v2047_v62  ;;  %v2088_v43 = vsel %vm4559_vm5, %v1982_v58, 0.0  ;;  %v2102_v54 = vrot.slane %v2901_v22, %v3866_v57  ;;  %v2093_v19 = vmul.f32 0.0, %v2092_v5 }
 0x6ef   : > { %v2076_v16 = vadd.f32 %v2074_v26, %v2062_v7  ;;  %vm4560_vm6 = vcmp.ge.s32.totalorder %v3888_v6, 10  ;;  %v2094_v23 = vmul.f32 %v2092_v5, %v2088_v43  ;;  %v2112_v24 = vrot.slane %v2901_v22, %v3885_v3  ;;  %v3369_v5 = vld [vmem:[%s4505_s14 + $0x10] sm:$0xff]  }
 0x6f0   : > { %v2075_v12 = vadd.f32 %v2073_v56, %v2061_v15  ;;  %v2098_v55 = vsel %vm4560_vm6, %v1996_v61, 0.0  ;;  %v2103_v30 = vmul.f32 0.0, %v2102_v54  ;;  %v2108_v32 = vsel %vm1466_vm14, %v2010_v51, 0.0  ;;  %v3370_v15 = vld [vmem:[%s4505_s14 + $0x8] sm:$0xff]   ;;  %v3371_v56 = vld [vmem:[%s4505_s14] sm:$0xff]  }
 0x6f1   : > { %v2086_v44 = vadd.f32 %v2084_v17, %v2076_v16  ;;  %v2104_v33 = vmul.f32 %v2102_v54, %v2098_v55  ;;  %v2122_v31 = vrot.slane %v2901_v22, %v3896_v10  ;;  %v2113_v57 = vmul.f32 0.0, %v2112_v24 }
 0x6f2   : > { %v2085_v49 = vadd.f32 %v2083_v8, %v2075_v12  ;;  %vm4561_vm7 = vcmp.ge.s32.totalorder %v3888_v6, 12  ;;  %v2114_v61 = vmul.f32 %v2112_v24, %v2108_v32  ;;  %v2132_v37 = vrot.slane %v2901_v22, %v3899_v11  ;;  %v2919_v8 = vld [vmem:[%s4504_s13 + $0x1] ss:$0 sm:$0xff] }
 0x6f3   : > { %v2096_v58 = vadd.f32 %v2094_v23, %v2086_v44  ;;  %v2118_v36 = vsel %vm4561_vm7, %v2024_v27, 0.0  ;;  %v2123_v3 = vmul.f32 0.0, %v2122_v31  ;;  %v2128_v9 = vsel %vm1498_vm12, %v2038_v2, 0.0 }
 0x6f4   : > { %v2095_v35 = vadd.f32 %v2093_v19, %v2085_v49  ;;  %v2124_v51 = vmul.f32 %v2122_v31, %v2118_v36  ;;  %v2142_v47 = vrot.slane %v2901_v22, %v3904_v13  ;;  %v2133_v10 = vmul.f32 0.0, %v2132_v37  ;;  %v1924_v13 = vpop.f32.mrf.mxu1  ;;  %v3373_v36 = vld [vmem:[%s4507_s16 + $0x30] sm:$0xff]  }
 0x6f5   : > { %v2106_v21 = vadd.f32 %v2104_v33, %v2096_v58  ;;  %v2138_v28 = vsel %vm1514_vm13, %v2052_v45, 0.0  ;;  %v2134_v27 = vmul.f32 %v2132_v37, %v2128_v9  ;;  %v2152_v50 = vrot.slane %v2901_v22, %v3907_v14  ;;  %v2287_v33 = vld [vmem:[%s698_s22] sm:$0xff]  ;;  %v3376_v37 = vld [vmem:[%s4507_s16 + $0x18] sm:$0xff]  }
 0x6f6   : > { %v2105_v39 = vadd.f32 %v2103_v30, %v2095_v35  ;;  %v2143_v11 = vmul.f32 0.0, %v2142_v47  ;;  %v2148_v53 = vsel %vm1530_vm15, %v2066_v20, 0.0  ;;  %v2144_v2 = vmul.f32 %v2142_v47, %v2138_v28  ;;  %v3368_v20 = vld [vmem:[%s4505_s14 + $0x18] sm:$0xff]   ;;  %v3379_v9 = vld [vmem:[%s4507_s16] sm:$0xff]  }
 0x6f7   : > { %v2116_v46 = vadd.f32 %v2114_v61, %v2106_v21  ;;  %v1748_v60 = vrot.slane %v4204_v42, %v3881_v0  ;;  %v2153_v34 = vmul.f32 0.0, %v2152_v50  ;;  %v2154_v18 = vmul.f32 %v2152_v50, %v2148_v53  ;;  %v3365_v0 = vld [vmem:[%s4505_s14 + $0x30] sm:$0xff]   ;;  %v3366_v42 = vld [vmem:[%s4505_s14 + $0x28] sm:$0xff]   ;;  %v3375_v61 = vld [vmem:[%s4507_s16 + $0x20] sm:$0xff]  }
 0x6f8   : > { %v2115_v38 = vadd.f32 %v2113_v57, %v2105_v39  ;;  %3167 = vmatpush3.bf16.msra.mxu0 %v3365_v0  ;;  %v3374_v21 = vld [vmem:[%s4507_s16 + $0x28] sm:$0xff]   ;;  %v3377_v39 = vld [vmem:[%s4507_s16 + $0x10] sm:$0xff]  }
 0x6f9   : > { %v2126_v48 = vadd.f32 %v2124_v51, %v2116_v46  ;;  %v1925_v62 = vadd.f32 %v1924_v13, %v1748_v60  ;;  %v1921_v14 = vadd.f32 %v4215_v29, %v1748_v60  ;;  %3168 = vmatprep.subr.bf16.mxu0 %v3466_v1  ;;  %v3367_v29 = vld [vmem:[%s4505_s14 + $0x20] sm:$0xff]  }
 0x6fa   : > { %v2125_v52 = vadd.f32 %v2123_v3, %v2115_v38  ;;  %v3378_v3 = vld [vmem:[%s4507_s16 + $0x8] sm:$0xff]   ;;  %v2928_v46 = vld [vmem:[%s4506_s15] ss:$0 sm:$0xff] }
 0x6fb   : > { %v2136_v59 = vadd.f32 %v2134_v27, %v2126_v48 }
 0x6fc   : > { %v2135_v41 = vadd.f32 %v2133_v10, %v2125_v52  ;;  %3169 = vmatpush3.bf16.msra.mxu0 %v3366_v42 }
 0x6fd   : > { %v2146_v25 = vadd.f32 %v2144_v2, %v2136_v59  ;;  %3170 = vmatprep.subr.bf16.mxu0 %v3466_v1 }
 0x6fe   : > { %v2145_v45 = vadd.f32 %v2143_v11, %v2135_v41  ;;  %v3380_v41 = vld [vmem:[%s4509_s18 + $0x38] sm:$0xff]  }
 0x6ff   : > { %v2156_v4 = vadd.f32 %v2154_v18, %v2146_v25  ;;  %v3382_v25 = vld [vmem:[%s4509_s18 + $0x28] sm:$0xff]   ;;  %v3383_v18 = vld [vmem:[%s4509_s18 + $0x20] sm:$0xff]  }
 0x700   : > { %v2155_v22 = vadd.f32 %v2153_v34, %v2145_v45  ;;  %3171 = vmatpush3.bf16.msra.mxu0 %v3367_v29  ;;  %v3381_v34 = vld [vmem:[%s4509_s18 + $0x30] sm:$0xff]   ;;  %v3384_v45 = vld [vmem:[%s4509_s18 + $0x18] sm:$0xff]  }
 0x701   : > { %v2158_v7 = vmul.f32 %v2156_v4, %v1925_v62  ;;  %3172 = vmatprep.subr.bf16.mxu0 %v3466_v1  ;;  %v3385_v62 = vld [vmem:[%s4509_s18 + $0x10] sm:$0xff]   ;;  %v3386_v4 = vld [vmem:[%s4509_s18 + $0x8] sm:$0xff]  }
 0x702   : > { %v2157_v26 = vmul.f32 %v2155_v22, %v1921_v14  ;;  %v3387_v14 = vld [vmem:[%s4509_s18] sm:$0xff]  }
 0x703   : > { %v2937_v22 = vld [vmem:[%s4508_s17] ss:$0 sm:$0xff] }
 0x704   : > { %v2159_v6 = vpack.c.bf16 %v2158_v7, %v2157_v26  ;;  %3173 = vmatpush3.bf16.msra.mxu0 %v3368_v20 }
 0x705   : > { %3174 = vmatprep.subr.bf16.mxu0 %v3466_v1 }
 0x706   : > { %3161 = vmatmul.mubr.bf16.vlgmr.msra.gmra.mxu1 %v2159_v6 }
 0x707   : > { %3200 = vmatprep.mubr.msk.bf16.mxu1 %vm3467_vm0, %v3466_v1 }
 0x708   : > { %3175 = vmatpush3.bf16.msra.mxu0 %v3369_v5 }
 0x709   : > { %3176 = vmatprep.subr.bf16.mxu0 %v3466_v1 }
 0x70c   : > { %3177 = vmatpush3.bf16.msra.mxu0 %v3370_v15 }
 0x70d   : > { %3178 = vmatprep.subr.bf16.mxu0 %v3466_v1 }
 0x710   : > { %3179 = vmatpush3.bf16.msra.mxu0 %v3371_v56 }
 0x711   : > { %3204 = vmatprep.subr.bf16.mxu0 %v3466_v1 }
 0x7c6   : > { %v2267_v43 = vpop.f32.mrf.mxu1 }
 0x7c7   : > { %v2268_v16 = vadd.f32 %v2919_v8, %v2267_v43 }
 0x7c8   : > { %v3162_v17 = vpop.f32.mrf.mxu1 }
 0x7c9   : > { %v2274_v54 = vadd.f32 %v2268_v16, %v4055_v63 }
 0x7ca   : > { %v2270_v12 = vpop.f32.mrf.mxu1 }
 0x7cb   : > { %2276 = vst [vmem:[%s4351_s30] sm:$0xff] %v2274_v54  ;;  %v2271_v19 = vadd.f32 %v2919_v8, %v2270_v12 }
 0x7cc   : > { %v3163_v55 = vpop.f32.mrf.mxu1 }
 0x7cd   : > { %v2275_v44 = vadd.f32 %v2271_v19, %v4059_v40  ;;  %v3372_v40 = vld [vmem:[%s4507_s16 + $0x38] sm:$0xff]  }
 0x7ce   : > { %3185 = vmatpush3.bf16.msra.mxu1 %v3372_v40 }
 0x7cf   : > { %2277 = vst [vmem:[%s4351_s30 + $0x8] sm:$0xff] %v2275_v44  ;;  %v2278_v23 = vadd.f32 %v2275_v44, %v2274_v54  ;;  %3186 = vmatprep.subr.bf16.mxu1 %v3466_v1  ;;  %s3469_s30 = smov [#allocation2]  }
 0x7d0   : > { %s3408_s28 = sshll.u32 %s3469_s30, 4  ;;  %s3409_s28 = int_to_ptr.vmem [resolvable:$false] %s3408_s28 }
 0x7d1   : > { %v2279_v24 = vrot.slane %v2278_v23, 4  ;;  %s3410_s6 = scalar_lea.vmem %s3409_s28, 512  ;;  %p3411_p0 = scmp.lt.s32.totalorder %s4433_s0, %s3409_s28 }
 0x7d2   : > { %3187 = vmatpush3.bf16.msra.mxu1 %v3373_v36  ;;  %p3412_p1 = scmp.lt.s32.totalorder %s3410_s6, %s3404_s27 }
 0x7d3   : > { %v2280_v49 = vadd.f32 %v2279_v24, %v2278_v23  ;;  %3188 = vmatprep.subr.bf16.mxu1 %v3466_v1 }
 0x7d4   : > { %p3413_p2 = por %p3412_p1, %p3411_p0 }
 0x7d5   : > { %v2281_v30 = vrot.slane %v2280_v49, 2 }
 0x7d6   : > { %3189 = vmatpush3.bf16.msra.mxu1 %v3374_v21  ;;  %p3414_p3 = pnand %p3413_p2, %p3407_p13 }
 0x7d7   : > { %v2282_v32 = vadd.f32 %v2281_v30, %v2280_v49  ;;  %3190 = vmatprep.subr.bf16.mxu1 %v3466_v1 }
 0x7d9   : > { %v2283_v58 = vrot.slane %v2282_v32, 1 }
 0x7da   : > { %3191 = vmatpush3.bf16.msra.mxu1 %v3375_v61 }
 0x7db   : > { %v2284_v63 = vadd.f32 %v2283_v58, %v2282_v32  ;;  %3192 = vmatprep.subr.bf16.mxu1 %v3466_v1 }
 0x7dd   : > { %v2286_v31 = vmul.f32 0.0625, %v2284_v63 }
 0x7de   : > { %3193 = vmatpush3.bf16.msra.mxu1 %v3376_v37 }
 0x7df   : > { %v2288_v35 = vadd.f32 %v2287_v33, %v2286_v31  ;;  %3194 = vmatprep.subr.bf16.mxu1 %v3466_v1 }
 0x7e1   : > { %v2289_v57 = vpack.c.bf16 %v2288_v35, %v2288_v35 }
 0x7e2   : > { %3195 = vmatpush3.bf16.msra.mxu1 %v3377_v39 }
 0x7e3   : > { %3181 = vmatmul.mubr.bf16.vlgmr.msra.gmra.mxu0 %v2289_v57  ;;  %3196 = vmatprep.subr.bf16.mxu1 %v3466_v1 }
 0x7e4   : > { %3220 = vmatprep.mubr.msk.bf16.mxu0 %vm3467_vm0, %v3466_v1  ;;  %3205 = vmatpush3.bf16.msra.mxu0 %v3380_v41 }
 0x7e5   : > { %3206 = vmatprep.subr.bf16.mxu0 %v3466_v1 }
 0x7e6   : > { %3197 = vmatpush3.bf16.msra.mxu1 %v3378_v3 }
 0x7e7   : > { %3198 = vmatprep.subr.bf16.mxu1 %v3466_v1 }
 0x7e8   : > { %3207 = vmatpush3.bf16.msra.mxu0 %v3381_v34 }
 0x7e9   : > { %3208 = vmatprep.subr.bf16.mxu0 %v3466_v1 }
 0x7ea   : > { %3199 = vmatpush3.bf16.msra.mxu1 %v3379_v9 }
 0x7ec   : > { %3209 = vmatpush3.bf16.msra.mxu0 %v3382_v25 }
 0x7ed   : > { %3210 = vmatprep.subr.bf16.mxu0 %v3466_v1 }
 0x7f0   : > { %3211 = vmatpush3.bf16.msra.mxu0 %v3383_v18 }
 0x7f1   : > { %3212 = vmatprep.subr.bf16.mxu0 %v3466_v1 }
 0x7f4   : > { %3213 = vmatpush3.bf16.msra.mxu0 %v3384_v45 }
 0x7f5   : > { %3214 = vmatprep.subr.bf16.mxu0 %v3466_v1 }
 0x7f8   : > { %3215 = vmatpush3.bf16.msra.mxu0 %v3385_v62 }
 0x7f9   : > { %3216 = vmatprep.subr.bf16.mxu0 %v3466_v1 }
 0x7fc   : > { %3217 = vmatpush3.bf16.msra.mxu0 %v3386_v4 }
 0x7fd   : > { %3218 = vmatprep.subr.bf16.mxu0 %v3466_v1 }
 0x800   : > { %3219 = vmatpush3.bf16.msra.mxu0 %v3387_v14 }
 0x8a3   : > { %v2395_v51 = vpop.f32.mrf.mxu0 }
 0x8a4   : > { %v2396_v47 = vadd.f32 %v2928_v46, %v2395_v51 }
 0x8a5   : > { %v3182_v38 = vpop.f32.mrf.mxu0 }
 0x8a6   : > { %v2401_v10 = vmul.f32 %v2396_v47, %v2396_v47 }
 0x8a7   : > { %v2398_v28 = vpop.f32.mrf.mxu0 }
 0x8a8   : > { %v2402_v48 = vmul.f32 %v2401_v10, %v2396_v47 }
 0x8a9   : > { %v3183_v27 = vpop.f32.mrf.mxu0 }
 0x8aa   : > { %v2403_v50 = vmul.f32 0.044715, %v2402_v48 }
 0x8ac   : > { %v2404_v52 = vadd.f32 %v2403_v50, %v2396_v47 }
 0x8ae   : > { %v2405_v11 = vmul.f32 0.7978846, %v2404_v52 }
 0x8b0   : > { %3400 = vtanh.f32 %v2405_v11 }
 0x8bd   : > { %v3401_v53 = vpop.eup %3400 }
 0x8be   : > { %v2407_v59 = vadd.f32 1.0, %v3401_v53 }
 0x8c0   : > { %v2408_v2 = vmul.f32 0.5, %v2407_v59 }
 0x8c2   : > { %v2409_v60 = vmul.f32 %v2408_v2, %v2396_v47 }
 0x8c4   : > { %v2410_v13 = vpack.c.bf16 %v2409_v60, %v2409_v60 }
 0x8c6   : > { %3201 = vmatmul.mubr.bf16.vlgmr.msra.gmra.mxu1 %v2410_v13 }
 0x986   : > { %v2516_v7 = vpop.f32.mrf.mxu1 }
 0x987   : > { %v2517_v26 = vadd.f32 %v2937_v22, %v2516_v7 }
 0x988   : > { %v3202_v6 = vpop.f32.mrf.mxu1 }
 0x989   : > { %v2522_v0 = vmul.f32 %v2517_v26, %v2517_v26 }
 0x98a   : > { %v2519_v42 = vpop.f32.mrf.mxu1 }
 0x98b   : > { %v2523_v29 = vmul.f32 %v2522_v0, %v2517_v26 }
 0x98c   : > { %v3203_v20 = vpop.f32.mrf.mxu1 }
 0x98d   : > { %v2524_v5 = vmul.f32 0.044715, %v2523_v29 }
 0x98f   : > { %v2525_v15 = vadd.f32 %v2524_v5, %v2517_v26 }
 0x991   : > { %v2526_v56 = vmul.f32 0.7978846, %v2525_v15 }
 0x993   : > { %3402 = vtanh.f32 %v2526_v56 }
 0x9a0   : > { %v3403_v1 = vpop.eup %3402 }
 0x9a1   : > { %v2528_v8 = vadd.f32 1.0, %v3403_v1 }
 0x9a3   : > { %v2529_v43 = vmul.f32 0.5, %v2528_v8 }
 0x9a5   : > { %v2530_v16 = vmul.f32 %v2529_v43, %v2517_v26 }
 0x9a7   : > { %v2531_v17 = vpack.c.bf16 %v2530_v16, %v2530_v16 }
 0x9a9   : > { %3221 = vmatmul.mubr.bf16.vlgmr.msra.gmra.mxu0 %v2531_v17 }
 0x9aa   : > { %3417 = shalt.err (!%p3414_p3)
}
 0x9ab   : > { %s3418_s3 = scalar_lea.hbm %s4439_s21, 256  ;;  %s3422_s22 = scalar_lea.hbm %s4511_s20, 512 }
 0x9ac   : > { %p3419_p4 = scmp.ne.s32.totalorder %s4439_s21, %s3418_s3  ;;  %p3423_p9 = scmp.lt.s32.totalorder %s4439_s21, %s4511_s20 }
 0x9ad   : > { %p3424_p10 = scmp.lt.s32.totalorder %s3422_s22, %s3418_s3 }
 0x9ae   : > { %p3420_p7 = pnand %p3419_p4, %p3620_p5 }
 0x9af   : > { %p3425_p11 = por %p3424_p10, %p3423_p9 }
 0x9b0   : > { %p3421_p8 = pneg %p3420_p7 }
 0x9b2   : > { %p3426_p12 = pnand %p3425_p11, %p3421_p8 }
 0x9b4   : > { %3429 = shalt.err (!%p3426_p12)
}
 0x9b5   : > { %s3470_s6 = smov 128   ;;  %s3471_s28 = smov 8   ;;  %v2946_v54 = vld [vmem:[%s4510_s19] ss:$0 sm:$0xff] }
 0x9b6   : > { %3224 = dma.vmem_to_hbm [thread:$0]  (%p3620_p5), %s4433_s0, 256, %s4439_s21, %s4443_s2, %s3470_s6, %s3470_s6, %s3471_s28  }
 0x9b7   : > { %s4564_s4 = sshll.u32 %s3656_s26, 3  ;;  %s4565_s3 = sld [smem:[#allocation20_spill]] }
 0x9bd   : > { %s702_s22 = scalar_lea.vmem %s4565_s3, %s4564_s4 }
 0xa69   : > { %v2637_v12 = vpop.f32.mrf.mxu0 }
 0xa6a   : > { %v2638_v19 = vadd.f32 %v2946_v54, %v2637_v12 }
 0xa6b   : > { %v3222_v55 = vpop.f32.mrf.mxu0 }
 0xa6c   : > { %2643 = vst [vmem:[%s702_s22] sm:$0xff] %v2638_v19 }
 0xa6d   : > { %v2640_v44 = vpop.f32.mrf.mxu0 }
 0xa6f   : > { %v3223_v23 = vpop.f32.mrf.mxu0 }
 0xa70 PF: > { %s4566_s7 = sld [smem:[#allocation7_spill]] }
 0xa71   : > { %s4567_s8 = sld [smem:[#allocation5_spill]] }
 0xa76   : > { %p3230_p5 = scmp.ge.s32.totalorder %s4566_s7, 2 }
 0xa77   : > { %s2680_s0 = sand.u32 1, %s4567_s8  }
 0xa78   : > { %p3227_p13 = pnand %p3230_p5, %p3624_p6  ;;  %s2681_s26 = scalar_lea.sflag [#allocation3], %s2680_s0 }
 0xa7a   : > { %p3228_p0 = pneg %p3227_p13 }
 0xa7c   : > { %3447 = dma.done.wait (%p3228_p0), %s2681_s26, 256  }
 0xa7d   : > { %3449 = vsyncadd (%p3228_p0), %s2681_s26, 4294967040  ;;  %s4569_s27 = sld [smem:[#allocation8_spill]]  ;;  %s4572_s2 = smov %s3456_s25 }
 0xa7e   : > { %s4570_s21 = sld [smem:[#allocation6_spill]] }
 0xa7f   : > { %s4571_s26 = sld [smem:[#allocation9_spill]] }
 0xa83   : > { %p32_p1 = scmp.ge.s32.totalorder %s4569_s27, 4  }
 0xa84   : > { %s4573_s25 = smov %s4570_s21 }
 0xa85   :  { %34 = sbr.rel (!%p32_p1) target bundleno = 14 (0xe), region = 160 }
 0xa8a   :  { %2693 = vsyncpa [#allocation3], 1 }
 0xa8b   :  { %2695 = vsyncpa [#allocation3 + $0x1], 1 }

</bundles_post_ra>
